<compile_context>
chip_gen: v7x
topology: tpu7x:2x2x1
jax: 0.10.0
libtpu: 0.0.40
codegen_flags: <defaults>
</compile_context>

<pallas_src>
import functools

import jax
import jax.numpy as jnp
from jax import lax
from jax.experimental import pallas as pl
from jax.experimental.pallas import tpu as pltpu


BN_EPS = 1e-5
LRELU_SLOPE = 0.01          # PyTorch nn.LeakyReLU default
VMEM_LIMIT = 32 * 1024 * 1024


def _round_up(v, m):
    return (v + m - 1) // m * m


def _pad2(a, rows, cols):
    return jnp.pad(a, ((0, rows - a.shape[0]), (0, cols - a.shape[1])))


# ----------------------------------------------------------------------------
# Fused kernel: the whole MLP in one body, everything resident in VMEM.
# ----------------------------------------------------------------------------
def _fused_mlp_kernel(x_ref, w1_ref, b1_ref, g1_ref, be1_ref,
                      w2_ref, b2_ref, g2_ref, be2_ref,
                      w3_ref, b3_ref, o_ref,
                      *, valid_rows, needs_mask, slope, eps):
    f32 = jnp.float32
    bf16 = jnp.bfloat16
    inv_b = f32(1.0 / valid_rows)

    m_pad = x_ref.shape[0]
    if needs_mask:
        # Sublane-only iota: (m_pad, 1) mask over valid batch rows.
        row = lax.broadcasted_iota(jnp.int32, (m_pad, 1), 0)
        rmask = (row < valid_rows).astype(f32)
    else:
        rmask = None

    def lin_lrelu_bn(h_bf16, w_ref, b_ref, g_ref, be_ref):
        # bf16 x bf16 -> f32 accumulate on the MXU.
        y = jnp.dot(h_bf16, w_ref[...], preferred_element_type=f32) + b_ref[...]
        y = jnp.maximum(y, slope * y)                        # LeakyReLU
        # BatchNorm (train-mode batch stats) over the VALID rows only.
        ym = y * rmask if needs_mask else y
        mean = jnp.sum(ym, axis=0, keepdims=True) * inv_b    # (1, N)
        c = y - mean
        if needs_mask:
            c = c * rmask
        var = jnp.sum(c * c, axis=0, keepdims=True) * inv_b  # (1, N), biased
        scale = g_ref[...] * lax.rsqrt(var + eps)
        shift = be_ref[...] - mean * scale
        return (y * scale + shift).astype(bf16)

    h1 = lin_lrelu_bn(x_ref[...], w1_ref, b1_ref, g1_ref, be1_ref)
    h2 = lin_lrelu_bn(h1, w2_ref, b2_ref, g2_ref, be2_ref)
    o_ref[...] = (jnp.dot(h2, w3_ref[...], preferred_element_type=f32)
                  + b3_ref[...])


# ----------------------------------------------------------------------------
# One-time parameter preparation (hoisted OUT of the jitted forward):
# pad to lane-dense multiples of 128, transpose weights to (in, out),
# cast matmul operands to bf16, keep biases / BN affine params in f32 rows.
# ----------------------------------------------------------------------------
def prepare_params(w1, b1, g1, be1, w2, b2, g2, be2, w3, b3):
    f32, bf16 = jnp.float32, jnp.bfloat16
    d_in = w1.shape[1]
    h = w1.shape[0]
    d_out = w3.shape[0]
    d_in_p = _round_up(d_in, 128)
    h_p = _round_up(h, 128)
    d_out_p = _round_up(d_out, 128)

    def row(v, n):
        return _pad2(jnp.asarray(v, f32)[None, :], 1, n)

    params = dict(
        w1=_pad2(jnp.asarray(w1, f32).T, d_in_p, h_p).astype(bf16),
        b1=row(b1, h_p), g1=row(g1, h_p), be1=row(be1, h_p),
        w2=_pad2(jnp.asarray(w2, f32).T, h_p, h_p).astype(bf16),
        b2=row(b2, h_p), g2=row(g2, h_p), be2=row(be2, h_p),
        w3=_pad2(jnp.asarray(w3, f32).T, h_p, d_out_p).astype(bf16),
        b3=row(b3, d_out_p),
    )
    return params, d_out


# ----------------------------------------------------------------------------
# Forward pass (jitted): pad the batch, run the single fused kernel, slice.
# ----------------------------------------------------------------------------
@functools.partial(jax.jit, static_argnames=("d_out",))
def linear_generator_forward(x, params, *, d_out):
    B = x.shape[0]
    d_in_p = params["w1"].shape[0]
    d_out_p = params["w3"].shape[1]

    m_pad = _round_up(max(B, 16), 16)          # bf16 sublane-friendly batch pad
    x_p = _pad2(x.astype(jnp.float32), m_pad, d_in_p).astype(jnp.bfloat16)

    kernel = functools.partial(
        _fused_mlp_kernel,
        valid_rows=B,
        needs_mask=(m_pad != B),
        slope=LRELU_SLOPE,
        eps=BN_EPS,
    )

    out = pl.pallas_call(
        kernel,
        out_shape=jax.ShapeDtypeStruct((m_pad, d_out_p), jnp.float32),
        compiler_params=pltpu.CompilerParams(vmem_limit_bytes=VMEM_LIMIT),
    )(x_p,
      params["w1"], params["b1"], params["g1"], params["be1"],
      params["w2"], params["b2"], params["g2"], params["be2"],
      params["w3"], params["b3"])

    return out[:B, :d_out]


# ----------------------------------------------------------------------------
# Pure-JAX f32 reference (spec semantics).
# ----------------------------------------------------------------------------
def _reference(x, w1, b1, g1, be1, w2, b2, g2, be2, w3, b3):
    def lin(h, w, b):
        return h @ w.T + b

    def lrelu(v):
        return jnp.where(v > 0, v, LRELU_SLOPE * v)

    def bn(v, g, be):
        mean = jnp.mean(v, axis=0)
        var = jnp.mean((v - mean) ** 2, axis=0)      # biased (train-mode)
        return g * (v - mean) * lax.rsqrt(var + BN_EPS) + be

    h = bn(lrelu(lin(x, w1, b1)), g1, be1)
    h = bn(lrelu(lin(h, w2, b2)), g2, be2)
    return lin(h, w3, b3)


if __name__ == "__main__":
    input_dim, hidden, output_dim = 32, 500, 64
    batch = 37                      # not a multiple of the pad -> exercises masking

    key = jax.random.PRNGKey(0)
    keys = jax.random.split(key, 11)

    def init_linear(kw, kb, fan_in, fan_out):
        lim = 1.0 / jnp.sqrt(jnp.float32(fan_in))
        w = jax.random.uniform(kw, (fan_out, fan_in), jnp.float32, -lim, lim)
        b = jax.random.uniform(kb, (fan_out,), jnp.float32, -lim, lim)
        return w, b

    w1, b1 = init_linear(keys[0], keys[1], input_dim, hidden)
    w2, b2 = init_linear(keys[2], keys[3], hidden, hidden)
    w3, b3 = init_linear(keys[4], keys[5], hidden, output_dim)
    g1 = 1.0 + 0.1 * jax.random.normal(keys[6], (hidden,), jnp.float32)
    be1 = 0.1 * jax.random.normal(keys[7], (hidden,), jnp.float32)
    g2 = 1.0 + 0.1 * jax.random.normal(keys[8], (hidden,), jnp.float32)
    be2 = 0.1 * jax.random.normal(keys[9], (hidden,), jnp.float32)
    x = jax.random.normal(keys[10], (batch, input_dim), jnp.float32)

    # One-time parameter prep (padding / transpose / bf16 cast hoisted here).
    params, d_out = prepare_params(w1, b1, g1, be1, w2, b2, g2, be2, w3, b3)
    params = jax.tree.map(jax.block_until_ready, params)

    out = linear_generator_forward(x, params, d_out=d_out)
    out = jax.block_until_ready(out)

    ref = _reference(x, w1, b1, g1, be1, w2, b2, g2, be2, w3, b3)
    assert out.shape == (batch, output_dim)
    # bf16 MXU inputs (f32 accumulate) -> loose-but-safe tolerance.
    assert jnp.allclose(out, ref, atol=5e-2, rtol=5e-2), (
        f"max abs err {jnp.max(jnp.abs(out - ref))}")

    print("KERNEL_OK")
</pallas_src>

<mosaic_0001>
module attributes {stable_mosaic.version = 11 : i64} {
  func.func @_fused_mlp_kernel(%arg0: memref<48x128xbf16, #tpu.memory_space<vmem>>, %arg1: memref<128x512xbf16, #tpu.memory_space<vmem>>, %arg2: memref<1x512xf32, #tpu.memory_space<vmem>>, %arg3: memref<1x512xf32, #tpu.memory_space<vmem>>, %arg4: memref<1x512xf32, #tpu.memory_space<vmem>>, %arg5: memref<512x512xbf16, #tpu.memory_space<vmem>>, %arg6: memref<1x512xf32, #tpu.memory_space<vmem>>, %arg7: memref<1x512xf32, #tpu.memory_space<vmem>>, %arg8: memref<1x512xf32, #tpu.memory_space<vmem>>, %arg9: memref<512x128xbf16, #tpu.memory_space<vmem>>, %arg10: memref<1x128xf32, #tpu.memory_space<vmem>>, %arg11: memref<48x128xf32, #tpu.memory_space<vmem>>) attributes {dimension_semantics = [], scalar_prefetch = 0 : i64, scratch_operands = 0 : i64, tpu.core_type = #tpu.core_type<tc>} {
    %0 = tpu.iota {dimensions = array<i32: 0>} : vector<48x1xi32>
    %c37_i32 = arith.constant 37 : i32
    %1 = vector.broadcast %c37_i32 : i32 to vector<48x1xi32>
    %2 = arith.cmpi slt, %0, %1 : vector<48x1xi32>
    %3 = arith.extui %2 : vector<48x1xi1> to vector<48x1xi32>
    %4 = arith.sitofp %3 : vector<48x1xi32> to vector<48x1xf32>
    %c0 = arith.constant 0 : index
    %c0_0 = arith.constant 0 : index
    %5 = vector.load %arg0[%c0, %c0_0] : memref<48x128xbf16, #tpu.memory_space<vmem>>, vector<48x128xbf16>
    %c0_1 = arith.constant 0 : index
    %c0_2 = arith.constant 0 : index
    %6 = vector.load %arg1[%c0_1, %c0_2] : memref<128x512xbf16, #tpu.memory_space<vmem>>, vector<128x512xbf16>
    %cst = arith.constant dense<0.000000e+00> : vector<48x512xf32>
    %7 = tpu.matmul %5, %6, %cst {dimension_numbers = #tpu.dot_dimension_numbers<[1], [0], [0], [1], [0, 0, 1, 1], [], []>} : vector<48x128xbf16>, vector<128x512xbf16>, vector<48x512xf32> -> vector<48x512xf32>
    %c0_3 = arith.constant 0 : index
    %c0_4 = arith.constant 0 : index
    %8 = vector.load %arg2[%c0_3, %c0_4] : memref<1x512xf32, #tpu.memory_space<vmem>>, vector<1x512xf32>
    %9 = vector.broadcast %8 : vector<1x512xf32> to vector<48x512xf32>
    %10 = arith.addf %7, %9 : vector<48x512xf32>
    %cst_5 = arith.constant 0.00999999977 : f32
    %11 = vector.broadcast %cst_5 : f32 to vector<48x512xf32>
    %12 = arith.mulf %11, %10 : vector<48x512xf32>
    %13 = arith.maximumf %10, %12 : vector<48x512xf32>
    %14 = vector.broadcast %4 : vector<48x1xf32> to vector<48x512xf32>
    %15 = arith.mulf %13, %14 : vector<48x512xf32>
    %cst_6 = arith.constant dense<0.000000e+00> : vector<512xf32>
    %16 = vector.multi_reduction <add>, %15, %cst_6 [0] : vector<48x512xf32> to vector<512xf32>
    %17 = vector.shape_cast %16 : vector<512xf32> to vector<1x512xf32>
    %cst_7 = arith.constant 0.0270270277 : f32
    %18 = vector.broadcast %cst_7 : f32 to vector<1x512xf32>
    %19 = arith.mulf %17, %18 : vector<1x512xf32>
    %20 = vector.broadcast %19 : vector<1x512xf32> to vector<48x512xf32>
    %21 = arith.subf %13, %20 : vector<48x512xf32>
    %22 = vector.broadcast %4 : vector<48x1xf32> to vector<48x512xf32>
    %23 = arith.mulf %21, %22 : vector<48x512xf32>
    %24 = arith.mulf %23, %23 : vector<48x512xf32>
    %cst_8 = arith.constant dense<0.000000e+00> : vector<512xf32>
    %25 = vector.multi_reduction <add>, %24, %cst_8 [0] : vector<48x512xf32> to vector<512xf32>
    %26 = vector.shape_cast %25 : vector<512xf32> to vector<1x512xf32>
    %cst_9 = arith.constant 0.0270270277 : f32
    %27 = vector.broadcast %cst_9 : f32 to vector<1x512xf32>
    %28 = arith.mulf %26, %27 : vector<1x512xf32>
    %c0_10 = arith.constant 0 : index
    %c0_11 = arith.constant 0 : index
    %29 = vector.load %arg3[%c0_10, %c0_11] : memref<1x512xf32, #tpu.memory_space<vmem>>, vector<1x512xf32>
    %cst_12 = arith.constant 9.99999974E-6 : f32
    %30 = vector.broadcast %cst_12 : f32 to vector<1x512xf32>
    %31 = arith.addf %28, %30 : vector<1x512xf32>
    %32 = math.rsqrt %31 : vector<1x512xf32>
    %33 = arith.mulf %29, %32 : vector<1x512xf32>
    %c0_13 = arith.constant 0 : index
    %c0_14 = arith.constant 0 : index
    %34 = vector.load %arg4[%c0_13, %c0_14] : memref<1x512xf32, #tpu.memory_space<vmem>>, vector<1x512xf32>
    %35 = arith.mulf %19, %33 : vector<1x512xf32>
    %36 = arith.subf %34, %35 : vector<1x512xf32>
    %37 = vector.broadcast %33 : vector<1x512xf32> to vector<48x512xf32>
    %38 = arith.mulf %13, %37 : vector<48x512xf32>
    %39 = vector.broadcast %36 : vector<1x512xf32> to vector<48x512xf32>
    %40 = arith.addf %38, %39 : vector<48x512xf32>
    %41 = arith.truncf %40 : vector<48x512xf32> to vector<48x512xbf16>
    %c0_15 = arith.constant 0 : index
    %c0_16 = arith.constant 0 : index
    %42 = vector.load %arg5[%c0_15, %c0_16] : memref<512x512xbf16, #tpu.memory_space<vmem>>, vector<512x512xbf16>
    %cst_17 = arith.constant dense<0.000000e+00> : vector<48x512xf32>
    %43 = tpu.matmul %41, %42, %cst_17 {dimension_numbers = #tpu.dot_dimension_numbers<[1], [0], [0], [1], [0, 0, 1, 1], [], []>} : vector<48x512xbf16>, vector<512x512xbf16>, vector<48x512xf32> -> vector<48x512xf32>
    %c0_18 = arith.constant 0 : index
    %c0_19 = arith.constant 0 : index
    %44 = vector.load %arg6[%c0_18, %c0_19] : memref<1x512xf32, #tpu.memory_space<vmem>>, vector<1x512xf32>
    %45 = vector.broadcast %44 : vector<1x512xf32> to vector<48x512xf32>
    %46 = arith.addf %43, %45 : vector<48x512xf32>
    %cst_20 = arith.constant 0.00999999977 : f32
    %47 = vector.broadcast %cst_20 : f32 to vector<48x512xf32>
    %48 = arith.mulf %47, %46 : vector<48x512xf32>
    %49 = arith.maximumf %46, %48 : vector<48x512xf32>
    %50 = vector.broadcast %4 : vector<48x1xf32> to vector<48x512xf32>
    %51 = arith.mulf %49, %50 : vector<48x512xf32>
    %cst_21 = arith.constant dense<0.000000e+00> : vector<512xf32>
    %52 = vector.multi_reduction <add>, %51, %cst_21 [0] : vector<48x512xf32> to vector<512xf32>
    %53 = vector.shape_cast %52 : vector<512xf32> to vector<1x512xf32>
    %cst_22 = arith.constant 0.0270270277 : f32
    %54 = vector.broadcast %cst_22 : f32 to vector<1x512xf32>
    %55 = arith.mulf %53, %54 : vector<1x512xf32>
    %56 = vector.broadcast %55 : vector<1x512xf32> to vector<48x512xf32>
    %57 = arith.subf %49, %56 : vector<48x512xf32>
    %58 = vector.broadcast %4 : vector<48x1xf32> to vector<48x512xf32>
    %59 = arith.mulf %57, %58 : vector<48x512xf32>
    %60 = arith.mulf %59, %59 : vector<48x512xf32>
    %cst_23 = arith.constant dense<0.000000e+00> : vector<512xf32>
    %61 = vector.multi_reduction <add>, %60, %cst_23 [0] : vector<48x512xf32> to vector<512xf32>
    %62 = vector.shape_cast %61 : vector<512xf32> to vector<1x512xf32>
    %cst_24 = arith.constant 0.0270270277 : f32
    %63 = vector.broadcast %cst_24 : f32 to vector<1x512xf32>
    %64 = arith.mulf %62, %63 : vector<1x512xf32>
    %c0_25 = arith.constant 0 : index
    %c0_26 = arith.constant 0 : index
    %65 = vector.load %arg7[%c0_25, %c0_26] : memref<1x512xf32, #tpu.memory_space<vmem>>, vector<1x512xf32>
    %cst_27 = arith.constant 9.99999974E-6 : f32
    %66 = vector.broadcast %cst_27 : f32 to vector<1x512xf32>
    %67 = arith.addf %64, %66 : vector<1x512xf32>
    %68 = math.rsqrt %67 : vector<1x512xf32>
    %69 = arith.mulf %65, %68 : vector<1x512xf32>
    %c0_28 = arith.constant 0 : index
    %c0_29 = arith.constant 0 : index
    %70 = vector.load %arg8[%c0_28, %c0_29] : memref<1x512xf32, #tpu.memory_space<vmem>>, vector<1x512xf32>
    %71 = arith.mulf %55, %69 : vector<1x512xf32>
    %72 = arith.subf %70, %71 : vector<1x512xf32>
    %73 = vector.broadcast %69 : vector<1x512xf32> to vector<48x512xf32>
    %74 = arith.mulf %49, %73 : vector<48x512xf32>
    %75 = vector.broadcast %72 : vector<1x512xf32> to vector<48x512xf32>
    %76 = arith.addf %74, %75 : vector<48x512xf32>
    %77 = arith.truncf %76 : vector<48x512xf32> to vector<48x512xbf16>
    %c0_30 = arith.constant 0 : index
    %c0_31 = arith.constant 0 : index
    %78 = vector.load %arg9[%c0_30, %c0_31] : memref<512x128xbf16, #tpu.memory_space<vmem>>, vector<512x128xbf16>
    %cst_32 = arith.constant dense<0.000000e+00> : vector<48x128xf32>
    %79 = tpu.matmul %77, %78, %cst_32 {dimension_numbers = #tpu.dot_dimension_numbers<[1], [0], [0], [1], [0, 0, 1, 1], [], []>} : vector<48x512xbf16>, vector<512x128xbf16>, vector<48x128xf32> -> vector<48x128xf32>
    %c0_33 = arith.constant 0 : index
    %c0_34 = arith.constant 0 : index
    %80 = vector.load %arg10[%c0_33, %c0_34] : memref<1x128xf32, #tpu.memory_space<vmem>>, vector<1x128xf32>
    %81 = vector.broadcast %80 : vector<1x128xf32> to vector<48x128xf32>
    %82 = arith.addf %79, %81 : vector<48x128xf32>
    %c0_35 = arith.constant 0 : index
    %c0_36 = arith.constant 0 : index
    %83 = vector.load %arg11[%c0_35, %c0_36] : memref<48x128xf32, #tpu.memory_space<vmem>>, vector<48x128xf32>
    tpu.vector_store %arg11[%c0_35, %c0_36], %82 {strides = array<i32>} : memref<48x128xf32, #tpu.memory_space<vmem>>, vector<48x128xf32>,
    return
  }
}

</mosaic_0001>

<bundles_post_ra>
// kernel: linear_generator_forward.1
= control target key start
LH: loop header
LB: loop body
LE: loop exit
PB: predicated region body
PF: predicated region fallthrough
CT: control target
= control target key end

     0   :  { %16 = vsyncpa [#allocation3], 0  ;;  %s4102_s0 = inlined_call_operand.vmem [shape: bf16[48,128], index: 0, kind: input, shape index: {}]   ;;  %s4103_s1 = inlined_call_operand.hbm [shape: bf16[128,512], index: 1, kind: input, shape index: {}]   ;;  %s4104_s2 = inlined_call_operand.vmem [shape: f32[1,512], index: 2, kind: input, shape index: {}]   ;;  %s4105_s3 = inlined_call_operand.vmem [shape: f32[1,512], index: 3, kind: input, shape index: {}]   ;;  %s4106_s4 = inlined_call_operand.vmem [shape: f32[1,512], index: 4, kind: input, shape index: {}]   ;;  %s4107_s5 = inlined_call_operand.hbm [shape: bf16[512,512], index: 5, kind: input, shape index: {}]   ;;  %s4108_s6 = inlined_call_operand.vmem [shape: f32[1,512], index: 6, kind: input, shape index: {}]   ;;  %s4109_s7 = inlined_call_operand.vmem [shape: f32[1,512], index: 7, kind: input, shape index: {}]   ;;  %s4110_s8 = inlined_call_operand.vmem [shape: f32[1,512], index: 8, kind: input, shape index: {}]   ;;  %s4111_s9 = inlined_call_operand.hbm [shape: bf16[512,128], index: 9, kind: input, shape index: {}]   ;;  %s4112_s10 = inlined_call_operand.vmem [shape: f32[1,128], index: 10, kind: input, shape index: {}]   ;;  %s4113_s11 = inlined_call_operand.vmem [shape: f32[48,128], index: 11, kind: output, shape index: {}]  }
   0x1   :  { %17 = vsyncpa [#allocation5], 0  ;;  %s3416_s17 = smov [#allocation4]   ;;  %s3417_s19 = smov [#allocation2]  }
   0x2   :  { %s43_s18 = sshll.u32 %s3416_s17, 4  ;;  %s25_s20 = sshll.u32 %s3417_s19, 4  ;;  %s44_s18 = int_to_ptr.vmem [resolvable:$true] %s43_s18  ;;  %s3486_s20 = int_to_ptr.vmem [resolvable:$true] %s25_s20 }
   0x3   :  { %s3346_s23 = scalar_lea.hbm %s4107_s5, 16384 }
   0x4   :  { %p3347_p0 = scmp.ne.s32.totalorder %s4107_s5, %s3346_s23  ;;  %p3350_p1 = scmp.lt.u32.totalorder %s3346_s23, %s4107_s5 }
   0x6   :  { %p3352_p2 = pnand %p3350_p1, %p3347_p0 }
   0x8   :  { %3355 = shalt.err (!%p3352_p2)
}
   0x9   :  { %s3356_s28 = scalar_lea.vmem %s44_s18, 16384  ;;  %p3361_p4 = scmp.lt.s32.totalorder %s44_s18, %s44_s18 }
   0xa   :  { %p3357_p3 = scmp.ne.s32.totalorder %s44_s18, %s3356_s28  ;;  %p3362_p5 = scmp.lt.s32.totalorder %s3356_s28, %s3356_s28 }
   0xc   :  { %p3363_p6 = por %p3362_p5, %p3361_p4 }
   0xe   :  { %p3364_p7 = pnand %p3363_p6, %p3357_p3 }
  0x10   :  { %3367 = shalt.err (!%p3364_p7)
}
  0x11   :  { %s3418_s29 = smov 256   ;;  %s3419_s30 = smov 16  }
  0x12   :  { %49 = dma.hbm_to_vmem [thread:$0]  %s4107_s5, 16384, %s44_s18, [#allocation5], %s3418_s29, %s3418_s29, %s3419_s30  }
  0x13   :  { %s3368_s16 = scalar_lea.hbm %s4103_s1, 4096 }
  0x14   :  { %p3369_p8 = scmp.ne.s32.totalorder %s4103_s1, %s3368_s16  ;;  %p3372_p9 = scmp.lt.u32.totalorder %s3368_s16, %s4103_s1 }
  0x16   :  { %p3374_p10 = pnand %p3372_p9, %p3369_p8 }
  0x18   :  { %3377 = shalt.err (!%p3374_p10)
}
  0x19   :  { %s3378_s23 = scalar_lea.vmem %s3486_s20, 4096  ;;  %p3383_p12 = scmp.lt.s32.totalorder %s3486_s20, %s3486_s20 }
  0x1a   :  { %p3379_p11 = scmp.ne.s32.totalorder %s3486_s20, %s3378_s23  ;;  %p3384_p13 = scmp.lt.s32.totalorder %s3378_s23, %s3378_s23 }
  0x1c   :  { %p3385_p0 = por %p3384_p13, %p3383_p12 }
  0x1e   :  { %p3386_p1 = pnand %p3385_p0, %p3379_p11 }
  0x20   :  { %3389 = shalt.err (!%p3386_p1)
}
  0x21   :  { %31 = dma.hbm_to_vmem [thread:$0]  %s4103_s1, 4096, %s3486_s20, [#allocation3], %s3418_s29, %s3418_s29, %s3419_s30  }
  0x22   :  { %s3420_s24 = smov [#allocation6]   ;;  %s3390_s28 = scalar_lea.hbm %s4111_s9, 4096 }
  0x23   :  { %s61_s25 = sshll.u32 %s3420_s24, 4  ;;  %p3391_p2 = scmp.ne.s32.totalorder %s4111_s9, %s3390_s28  ;;  %s62_s25 = int_to_ptr.vmem [resolvable:$true] %s61_s25 }
  0x24   :  { %p3394_p3 = scmp.lt.u32.totalorder %s3390_s28, %s4111_s9 }
  0x26   :  { %p3396_p4 = pnand %p3394_p3, %p3391_p2 }
  0x28   :  { %3399 = shalt.err (!%p3396_p4)
}
  0x29   :  { %s3400_s16 = scalar_lea.vmem %s62_s25, 4096  ;;  %p3405_p6 = scmp.lt.s32.totalorder %s62_s25, %s62_s25 }
  0x2a   :  { %p3401_p5 = scmp.ne.s32.totalorder %s62_s25, %s3400_s16  ;;  %p3406_p7 = scmp.lt.s32.totalorder %s3400_s16, %s3400_s16 }
  0x2c   :  { %p3407_p8 = por %p3406_p7, %p3405_p6 }
  0x2e   :  { %p3408_p9 = pnand %p3407_p8, %p3401_p5 }
  0x30   :  { %3411 = shalt.err (!%p3408_p9)
}
  0x31   :  { %s3421_s1 = smov 64   ;;  %s3422_s20 = smov 4  }
  0x32   :  { %67 = dma.hbm_to_vmem [thread:$0]  %s4111_s9, 4096, %s62_s25, [#allocation5], %s3421_s1, %s3421_s1, %s3422_s20  }
  0x33   :  { %3412 = dma.done.wait [#allocation3], 4096  }
  0x34   :  { %3413 = vsyncadd [#allocation3], 4294963200 }
  0x35   :  { %3414 = dma.done.wait [#allocation5], 20480  }
  0x36   :  { %3415 = vsyncadd [#allocation5], 4294946816  ;;  %v3423_v0 = vmov 0   ;;  %v3055_v1 = vld [vmem:[#allocation2 + $0x4] ss:$16 sps:$4 sm:$0xff]   ;;  %v3104_v34 = vld [vmem:[%s4102_s0 + $0x8] sm:$0xff]  }
  0x37   :  { %375 = vmatprep.mubr.bf16.mxu0 %v3423_v0  ;;  %438 = vmatprep.mubr.bf16.mxu1 %v3423_v0  ;;  %v3057_v2 = vld [vmem:[#allocation2 + $0xc] ss:$16 sps:$4 sm:$0xff]   ;;  %v3059_v3 = vld [vmem:[#allocation2] ss:$16 sps:$4 sm:$0xff]   ;;  %v3060_v4 = vld [vmem:[#allocation2 + $0x8] ss:$16 sps:$4 sm:$0xff]  }
  0x38   :  { %343 = vmatprep.subr.bf16.mxu0 %v3055_v1  ;;  %406 = vmatprep.subr.bf16.mxu1 %v3057_v2  ;;  %v3061_v5 = vld [vmem:[#allocation2 + $0x24] ss:$16 sps:$4 sm:$0xff]   ;;  %v3063_v6 = vld [vmem:[#allocation2 + $0x2c] ss:$16 sps:$4 sm:$0xff]   ;;  %v3065_v7 = vld [vmem:[#allocation2 + $0x20] ss:$16 sps:$4 sm:$0xff]  }
  0x39   :  { %344 = vmatpush1.bf16.msra.mxu0 %v3059_v3  ;;  %407 = vmatpush1.bf16.msra.mxu1 %v3060_v4  ;;  %v3066_v8 = vld [vmem:[#allocation2 + $0x28] ss:$16 sps:$4 sm:$0xff]   ;;  %v3067_v9 = vld [vmem:[#allocation2 + $0x44] ss:$16 sps:$4 sm:$0xff]   ;;  %v3069_v10 = vld [vmem:[#allocation2 + $0x4c] ss:$16 sps:$4 sm:$0xff]  }
  0x3a   :  { %345 = vmatprep.subr.bf16.mxu0 %v3061_v5  ;;  %408 = vmatprep.subr.bf16.mxu1 %v3063_v6  ;;  %v3071_v11 = vld [vmem:[#allocation2 + $0x40] ss:$16 sps:$4 sm:$0xff]   ;;  %v3072_v12 = vld [vmem:[#allocation2 + $0x48] ss:$16 sps:$4 sm:$0xff]   ;;  %v3073_v13 = vld [vmem:[#allocation2 + $0x64] ss:$16 sps:$4 sm:$0xff]  }
  0x3b   :  { %v3075_v14 = vld [vmem:[#allocation2 + $0x6c] ss:$16 sps:$4 sm:$0xff]   ;;  %v3077_v15 = vld [vmem:[#allocation2 + $0x60] ss:$16 sps:$4 sm:$0xff]   ;;  %v3078_v16 = vld [vmem:[#allocation2 + $0x68] ss:$16 sps:$4 sm:$0xff]  }
  0x3c   :  { %v3079_v17 = vld [vmem:[#allocation2 + $0x84] ss:$16 sps:$4 sm:$0xff]   ;;  %v3081_v18 = vld [vmem:[#allocation2 + $0x8c] ss:$16 sps:$4 sm:$0xff]   ;;  %v3083_v19 = vld [vmem:[#allocation2 + $0x80] ss:$16 sps:$4 sm:$0xff]  }
  0x3d   :  { %346 = vmatpush1.bf16.msra.mxu0 %v3065_v7  ;;  %409 = vmatpush1.bf16.msra.mxu1 %v3066_v8  ;;  %v3084_v20 = vld [vmem:[#allocation2 + $0x88] ss:$16 sps:$4 sm:$0xff]   ;;  %v3085_v21 = vld [vmem:[#allocation2 + $0xa4] ss:$16 sps:$4 sm:$0xff]   ;;  %v3087_v22 = vld [vmem:[#allocation2 + $0xac] ss:$16 sps:$4 sm:$0xff]  }
  0x3e   :  { %347 = vmatprep.subr.bf16.mxu0 %v3067_v9  ;;  %410 = vmatprep.subr.bf16.mxu1 %v3069_v10  ;;  %v3089_v23 = vld [vmem:[#allocation2 + $0xa0] ss:$16 sps:$4 sm:$0xff]   ;;  %v3090_v24 = vld [vmem:[#allocation2 + $0xa8] ss:$16 sps:$4 sm:$0xff]   ;;  %v3091_v25 = vld [vmem:[#allocation2 + $0xc4] ss:$16 sps:$4 sm:$0xff]  }
  0x3f   :  { %v3093_v26 = vld [vmem:[#allocation2 + $0xcc] ss:$16 sps:$4 sm:$0xff]   ;;  %v3095_v27 = vld [vmem:[#allocation2 + $0xc0] ss:$16 sps:$4 sm:$0xff]   ;;  %v3096_v28 = vld [vmem:[#allocation2 + $0xc8] ss:$16 sps:$4 sm:$0xff]  }
  0x40   :  { %v3097_v29 = vld [vmem:[#allocation2 + $0xe4] ss:$16 sps:$4 sm:$0xff]   ;;  %v3099_v30 = vld [vmem:[#allocation2 + $0xec] ss:$16 sps:$4 sm:$0xff]   ;;  %v3101_v31 = vld [vmem:[#allocation2 + $0xe0] ss:$16 sps:$4 sm:$0xff]  }
  0x41   :  { %348 = vmatpush1.bf16.msra.mxu0 %v3071_v11  ;;  %411 = vmatpush1.bf16.msra.mxu1 %v3072_v12  ;;  %v3102_v32 = vld [vmem:[#allocation2 + $0xe8] ss:$16 sps:$4 sm:$0xff]   ;;  %v3103_v33 = vld [vmem:[%s4102_s0] sm:$0xff]   ;;  %v3105_v35 = vld [vmem:[%s4102_s0 + $0x10] sm:$0xff]  }
  0x42   :  { %349 = vmatprep.subr.bf16.mxu0 %v3073_v13  ;;  %412 = vmatprep.subr.bf16.mxu1 %v3075_v14  ;;  %v3108_v36 = vld [vmem:[#allocation4 + $0x4] ss:$16 sps:$4 sm:$0xff]   ;;  %v3111_v37 = vld [vmem:[#allocation4 + $0xc] ss:$16 sps:$4 sm:$0xff]   ;;  %v3106_v38 = vld [vmem:[#allocation4] ss:$16 sps:$4 sm:$0xff]  }
  0x43   :  { %v3109_v39 = vld [vmem:[#allocation4 + $0x8] ss:$16 sps:$4 sm:$0xff]   ;;  %v3114_v40 = vld [vmem:[#allocation4 + $0x24] ss:$16 sps:$4 sm:$0xff]   ;;  %v3117_v41 = vld [vmem:[#allocation4 + $0x2c] ss:$16 sps:$4 sm:$0xff]  }
  0x44   :  { %v3112_v42 = vld [vmem:[#allocation4 + $0x20] ss:$16 sps:$4 sm:$0xff]   ;;  %v3115_v43 = vld [vmem:[#allocation4 + $0x28] ss:$16 sps:$4 sm:$0xff]   ;;  %v3120_v44 = vld [vmem:[#allocation4 + $0x44] ss:$16 sps:$4 sm:$0xff]  }
  0x45   :  { %350 = vmatpush1.bf16.msra.mxu0 %v3077_v15  ;;  %413 = vmatpush1.bf16.msra.mxu1 %v3078_v16  ;;  %v3123_v45 = vld [vmem:[#allocation4 + $0x4c] ss:$16 sps:$4 sm:$0xff]   ;;  %v3118_v46 = vld [vmem:[#allocation4 + $0x40] ss:$16 sps:$4 sm:$0xff]   ;;  %v3121_v47 = vld [vmem:[#allocation4 + $0x48] ss:$16 sps:$4 sm:$0xff]  }
  0x46   :  { %351 = vmatprep.subr.bf16.mxu0 %v3079_v17  ;;  %414 = vmatprep.subr.bf16.mxu1 %v3081_v18  ;;  %v3126_v48 = vld [vmem:[#allocation4 + $0x64] ss:$16 sps:$4 sm:$0xff]   ;;  %v3129_v49 = vld [vmem:[#allocation4 + $0x6c] ss:$16 sps:$4 sm:$0xff]   ;;  %v3124_v50 = vld [vmem:[#allocation4 + $0x60] ss:$16 sps:$4 sm:$0xff]  }
  0x47   :  { %v3127_v51 = vld [vmem:[#allocation4 + $0x68] ss:$16 sps:$4 sm:$0xff]   ;;  %v3132_v52 = vld [vmem:[#allocation4 + $0x84] ss:$16 sps:$4 sm:$0xff]   ;;  %v3135_v53 = vld [vmem:[#allocation4 + $0x8c] ss:$16 sps:$4 sm:$0xff]  }
  0x48   :  { %v3130_v54 = vld [vmem:[#allocation4 + $0x80] ss:$16 sps:$4 sm:$0xff]   ;;  %v3133_v55 = vld [vmem:[#allocation4 + $0x88] ss:$16 sps:$4 sm:$0xff]   ;;  %v3138_v56 = vld [vmem:[#allocation4 + $0xa4] ss:$16 sps:$4 sm:$0xff]  }
  0x49   :  { %352 = vmatpush1.bf16.msra.mxu0 %v3083_v19  ;;  %415 = vmatpush1.bf16.msra.mxu1 %v3084_v20  ;;  %v3141_v57 = vld [vmem:[#allocation4 + $0xac] ss:$16 sps:$4 sm:$0xff]   ;;  %v3136_v58 = vld [vmem:[#allocation4 + $0xa0] ss:$16 sps:$4 sm:$0xff]   ;;  %v3139_v59 = vld [vmem:[#allocation4 + $0xa8] ss:$16 sps:$4 sm:$0xff]  }
  0x4a   :  { %353 = vmatprep.subr.bf16.mxu0 %v3085_v21  ;;  %416 = vmatprep.subr.bf16.mxu1 %v3087_v22  ;;  %v3144_v60 = vld [vmem:[#allocation4 + $0xc4] ss:$16 sps:$4 sm:$0xff]   ;;  %v3147_v61 = vld [vmem:[#allocation4 + $0xcc] ss:$16 sps:$4 sm:$0xff]   ;;  %v3142_v62 = vld [vmem:[#allocation4 + $0xc0] ss:$16 sps:$4 sm:$0xff]  }
  0x4b   :  { %v3145_v63 = vld [vmem:[#allocation4 + $0xc8] ss:$16 sps:$4 sm:$0xff]   ;;  %v3153_v1 = vld [vmem:[#allocation4 + $0xec] ss:$16 sps:$4 sm:$0xff]   ;;  %v3148_v2 = vld [vmem:[#allocation4 + $0xe0] ss:$16 sps:$4 sm:$0xff]  }
  0x4c   :  { %v3151_v3 = vld [vmem:[#allocation4 + $0xe8] ss:$16 sps:$4 sm:$0xff]   ;;  %v3156_v4 = vld [vmem:[#allocation4 + $0x104] ss:$16 sps:$4 sm:$0xff]   ;;  %v3159_v5 = vld [vmem:[#allocation4 + $0x10c] ss:$16 sps:$4 sm:$0xff]  }
  0x4d   :  { %354 = vmatpush1.bf16.msra.mxu0 %v3089_v23  ;;  %417 = vmatpush1.bf16.msra.mxu1 %v3090_v24  ;;  %v3154_v6 = vld [vmem:[#allocation4 + $0x100] ss:$16 sps:$4 sm:$0xff]   ;;  %v3157_v7 = vld [vmem:[#allocation4 + $0x108] ss:$16 sps:$4 sm:$0xff]   ;;  %v3162_v8 = vld [vmem:[#allocation4 + $0x124] ss:$16 sps:$4 sm:$0xff]  }
  0x4e   :  { %355 = vmatprep.subr.bf16.mxu0 %v3091_v25  ;;  %418 = vmatprep.subr.bf16.mxu1 %v3093_v26  ;;  %v3165_v9 = vld [vmem:[#allocation4 + $0x12c] ss:$16 sps:$4 sm:$0xff]   ;;  %v3160_v10 = vld [vmem:[#allocation4 + $0x120] ss:$16 sps:$4 sm:$0xff]   ;;  %v3163_v11 = vld [vmem:[#allocation4 + $0x128] ss:$16 sps:$4 sm:$0xff]   ;;  %v80_v26 = vlaneseq }
  0x4f   :  { %v3168_v12 = vld [vmem:[#allocation4 + $0x144] ss:$16 sps:$4 sm:$0xff]   ;;  %v3171_v13 = vld [vmem:[#allocation4 + $0x14c] ss:$16 sps:$4 sm:$0xff]   ;;  %v3166_v14 = vld [vmem:[#allocation4 + $0x140] ss:$16 sps:$4 sm:$0xff]  }
  0x50   :  { %v3169_v15 = vld [vmem:[#allocation4 + $0x148] ss:$16 sps:$4 sm:$0xff]   ;;  %v3174_v16 = vld [vmem:[#allocation4 + $0x164] ss:$16 sps:$4 sm:$0xff]   ;;  %v3177_v17 = vld [vmem:[#allocation4 + $0x16c] ss:$16 sps:$4 sm:$0xff]  }
  0x51   :  { %356 = vmatpush1.bf16.msra.mxu0 %v3095_v27  ;;  %419 = vmatpush1.bf16.msra.mxu1 %v3096_v28  ;;  %v3172_v18 = vld [vmem:[#allocation4 + $0x160] ss:$16 sps:$4 sm:$0xff]   ;;  %v3175_v19 = vld [vmem:[#allocation4 + $0x168] ss:$16 sps:$4 sm:$0xff]   ;;  %v3180_v20 = vld [vmem:[#allocation4 + $0x184] ss:$16 sps:$4 sm:$0xff]  }
  0x52   :  { %357 = vmatprep.subr.bf16.mxu0 %v3097_v29  ;;  %420 = vmatprep.subr.bf16.mxu1 %v3099_v30  ;;  %v3178_v21 = vld [vmem:[#allocation4 + $0x180] ss:$16 sps:$4 sm:$0xff]   ;;  %v3181_v22 = vld [vmem:[#allocation4 + $0x188] ss:$16 sps:$4 sm:$0xff]   ;;  %v3183_v23 = vld [vmem:[#allocation4 + $0x18c] ss:$16 sps:$4 sm:$0xff]  }
  0x53   :  { %v3186_v24 = vld [vmem:[#allocation4 + $0x1a4] ss:$16 sps:$4 sm:$0xff]   ;;  %v3189_v25 = vld [vmem:[#allocation4 + $0x1ac] ss:$16 sps:$4 sm:$0xff]   ;;  %v3184_v27 = vld [vmem:[#allocation4 + $0x1a0] ss:$16 sps:$4 sm:$0xff]  }
  0x54   :  { %v3187_v28 = vld [vmem:[#allocation4 + $0x1a8] ss:$16 sps:$4 sm:$0xff]   ;;  %v3192_v29 = vld [vmem:[#allocation4 + $0x1c4] ss:$16 sps:$4 sm:$0xff]   ;;  %v3195_v30 = vld [vmem:[#allocation4 + $0x1cc] ss:$16 sps:$4 sm:$0xff]  }
  0x55   :  { %358 = vmatpush1.bf16.msra.mxu0 %v3101_v31  ;;  %421 = vmatpush1.bf16.msra.mxu1 %v3102_v32  ;;  %v3544_v31 = vshrl.u32 %v80_v26, 7  ;;  %v3190_v32 = vld [vmem:[#allocation4 + $0x1c0] ss:$16 sps:$4 sm:$0xff]  }
  0x56   :  { %1675 = vmatprep.subr.bf16.mxu0 %v3108_v36  ;;  %1801 = vmatprep.subr.bf16.mxu1 %v3111_v37  ;;  %v143_v36 = vld [vmem:[%s4104_s2] sm:$0xf] }
  0x57   :  { %v3550_v37 = vsub.s32 0, %v3544_v31 }
  0x58   :  { %376 = vmatmul.mubr.bf16.vlgmr.msra.gmra.mrb[0].mxu0 %v3103_v33  ;;  %439 = vmatmul.mubr.bf16.vlgmr.msra.gmra.mrb[0].mxu1 %v3103_v33  ;;  %v3193_v33 = vld [vmem:[#allocation4 + $0x1c8] ss:$16 sps:$4 sm:$0xff]  }
  0x59   :  { %385 = vmatprep.mubr.bf16.mxu0 %v3423_v0  ;;  %448 = vmatprep.mubr.bf16.mxu1 %v3423_v0 }
  0x5a   :  { %1676 = vmatpush1.bf16.msra.mxu0 %v3106_v38  ;;  %1802 = vmatpush1.bf16.msra.mxu1 %v3109_v39  ;;  %v3553_v38 = vsub.s32 2, %v3544_v31  ;;  %v3556_v39 = vsub.s32 1, %v3544_v31 }
  0x5b   :  { %1677 = vmatprep.subr.bf16.mxu0 %v3114_v40  ;;  %1803 = vmatprep.subr.bf16.mxu1 %v3117_v41  ;;  %v3559_v40 = vsub.s32 3, %v3544_v31  ;;  %v3196_v41 = vld [vmem:[#allocation4 + $0x1e0] ss:$16 sps:$4 sm:$0xff]  }
  0x5e   :  { %1678 = vmatpush1.bf16.msra.mxu0 %v3112_v42  ;;  %1804 = vmatpush1.bf16.msra.mxu1 %v3115_v43  ;;  %v3199_v42 = vld [vmem:[#allocation4 + $0x1e8] ss:$16 sps:$4 sm:$0xff]   ;;  %v3562_v43 = vrot.slane %v143_v36, %v3550_v37 }
  0x5f   :  { %1679 = vmatprep.subr.bf16.mxu0 %v3120_v44  ;;  %1805 = vmatprep.subr.bf16.mxu1 %v3123_v45  ;;  %v3565_v44 = vrot.slane %v143_v36, %v3553_v38  ;;  %v3568_v45 = vrot.slane %v143_v36, %v3556_v39 }
  0x60   :  { %386 = vmatmul.mubr.bf16.gmra.mrb[4].mxu0 %v3104_v34  ;;  %449 = vmatmul.mubr.bf16.gmra.mrb[4].mxu1 %v3104_v34  ;;  %v3198_v34 = vld [vmem:[#allocation4 + $0x1e4] ss:$16 sps:$4 sm:$0xff]  }
  0x61   :  { %395 = vmatprep.mubr.bf16.mxu0 %v3423_v0  ;;  %458 = vmatprep.mubr.bf16.mxu1 %v3423_v0  ;;  %v3150_v0 = vld [vmem:[#allocation4 + $0xe4] ss:$16 sps:$4 sm:$0xff]  }
  0x62   :  { %1680 = vmatpush1.bf16.msra.mxu0 %v3118_v46  ;;  %1806 = vmatpush1.bf16.msra.mxu1 %v3121_v47  ;;  %v3571_v46 = vrot.slane %v143_v36, %v3559_v40  ;;  %v85_v47 = vadd.s32 32, %v3544_v31 }
  0x63   :  { %1681 = vmatprep.subr.bf16.mxu0 %v3126_v48  ;;  %1807 = vmatprep.subr.bf16.mxu1 %v3129_v49  ;;  %v3204_v48 = vld [vmem:[#allocation4 + $0x204] ss:$16 sps:$4 sm:$0xff]   ;;  %v3207_v49 = vld [vmem:[#allocation4 + $0x20c] ss:$16 sps:$4 sm:$0xff]  }
  0x64   :  { %vm91_vm0 = vcmp.lt.s32.totalorder %v85_v47, 37 }
  0x66   :  { %1682 = vmatpush1.bf16.msra.mxu0 %v3124_v50  ;;  %1808 = vmatpush1.bf16.msra.mxu1 %v3127_v51 }
  0x67   :  { %1683 = vmatprep.subr.bf16.mxu0 %v3132_v52  ;;  %1809 = vmatprep.subr.bf16.mxu1 %v3135_v53 }
  0x68   :  { %396 = vmatmul.mubr.bf16.gmra.mrb[8].mxu0 %v3105_v35  ;;  %459 = vmatmul.mubr.bf16.gmra.mrb[8].mxu1 %v3105_v35  ;;  %v3201_v35 = vld [vmem:[#allocation4 + $0x1ec] ss:$16 sps:$4 sm:$0xff]  }
  0x6a   :  { %1684 = vmatpush1.bf16.msra.mxu0 %v3130_v54  ;;  %1810 = vmatpush1.bf16.msra.mxu1 %v3133_v55 }
  0x6b   :  { %1685 = vmatprep.subr.bf16.mxu0 %v3138_v56  ;;  %1811 = vmatprep.subr.bf16.mxu1 %v3141_v57 }
  0x6e   :  { %1686 = vmatpush1.bf16.msra.mxu0 %v3136_v58  ;;  %1812 = vmatpush1.bf16.msra.mxu1 %v3139_v59 }
  0x6f   :  { %1687 = vmatprep.subr.bf16.mxu0 %v3144_v60  ;;  %1813 = vmatprep.subr.bf16.mxu1 %v3147_v61 }
  0x72   :  { %1688 = vmatpush1.bf16.msra.mxu0 %v3142_v62  ;;  %1814 = vmatpush1.bf16.msra.mxu1 %v3145_v63 }
  0x73   :  { %1689 = vmatprep.subr.bf16.mxu0 %v3150_v0  ;;  %1815 = vmatprep.subr.bf16.mxu1 %v3153_v1 }
  0x76   :  { %1690 = vmatpush1.bf16.msra.mxu0 %v3148_v2  ;;  %1816 = vmatpush1.bf16.msra.mxu1 %v3151_v3 }
  0x77   :  { %1691 = vmatprep.subr.bf16.mxu0 %v3156_v4  ;;  %1817 = vmatprep.subr.bf16.mxu1 %v3159_v5 }
  0x7a   :  { %1692 = vmatpush1.bf16.msra.mxu0 %v3154_v6  ;;  %1818 = vmatpush1.bf16.msra.mxu1 %v3157_v7 }
  0x7b   :  { %1693 = vmatprep.subr.bf16.mxu0 %v3162_v8  ;;  %1819 = vmatprep.subr.bf16.mxu1 %v3165_v9 }
  0x7e   :  { %1694 = vmatpush1.bf16.msra.mxu0 %v3160_v10  ;;  %1820 = vmatpush1.bf16.msra.mxu1 %v3163_v11  ;;  %v3424_v10 = vmov 0.0  }
  0x7f   :  { %1695 = vmatprep.subr.bf16.mxu0 %v3168_v12  ;;  %1821 = vmatprep.subr.bf16.mxu1 %v3171_v13  ;;  %v3583_v11 = vsel %vm91_vm0, 1.0, %v3424_v10 }
  0x82   :  { %1696 = vmatpush1.bf16.msra.mxu0 %v3166_v14  ;;  %1822 = vmatpush1.bf16.msra.mxu1 %v3169_v15 }
  0x83   :  { %1697 = vmatprep.subr.bf16.mxu0 %v3174_v16  ;;  %1823 = vmatprep.subr.bf16.mxu1 %v3177_v17 }
  0x86   :  { %1698 = vmatpush1.bf16.msra.mxu0 %v3172_v18  ;;  %1824 = vmatpush1.bf16.msra.mxu1 %v3175_v19 }
  0x87   :  { %1699 = vmatprep.subr.bf16.mxu0 %v3180_v20  ;;  %1825 = vmatprep.subr.bf16.mxu1 %v3183_v23 }
  0x8a   :  { %1700 = vmatpush1.bf16.msra.mxu0 %v3178_v21  ;;  %1826 = vmatpush1.bf16.msra.mxu1 %v3181_v22 }
  0x8b   :  { %1701 = vmatprep.subr.bf16.mxu0 %v3186_v24  ;;  %1827 = vmatprep.subr.bf16.mxu1 %v3189_v25 }
  0x8e   :  { %1702 = vmatpush1.bf16.msra.mxu0 %v3184_v27  ;;  %1828 = vmatpush1.bf16.msra.mxu1 %v3187_v28 }
  0x8f   :  { %1703 = vmatprep.subr.bf16.mxu0 %v3192_v29  ;;  %1829 = vmatprep.subr.bf16.mxu1 %v3195_v30 }
  0x92   :  { %1704 = vmatpush1.bf16.msra.mxu0 %v3190_v32  ;;  %1830 = vmatpush1.bf16.msra.mxu1 %v3193_v33 }
  0x93   :  { %1705 = vmatprep.subr.bf16.mxu0 %v3198_v34  ;;  %1831 = vmatprep.subr.bf16.mxu1 %v3201_v35 }
  0x96   :  { %1706 = vmatpush1.bf16.msra.mxu0 %v3196_v41  ;;  %1832 = vmatpush1.bf16.msra.mxu1 %v3199_v42 }
  0x97   :  { %1738 = vmatprep.subr.bf16.mxu0 %v3204_v48  ;;  %1864 = vmatprep.subr.bf16.mxu1 %v3207_v49 }
 0x12b   :  { %v377_v50 = vpop.f32.mrb[0].mxu0  ;;  %v440_v51 = vpop.f32.mrb[0].mxu1 }
 0x12c   :  { %v378_v52 = vadd.f32 %v377_v50, %v3562_v43  ;;  %v441_v53 = vadd.f32 %v440_v51, %v3565_v44  ;;  %v379_v54 = vpop.f32.mrb[1].mxu0  ;;  %v442_v55 = vpop.f32.mrb[1].mxu1 }
 0x12d   :  { %v380_v56 = vadd.f32 %v379_v54, %v3568_v45  ;;  %v443_v57 = vadd.f32 %v442_v55, %v3571_v46  ;;  %v381_v58 = vpop.f32.mrb[2].mxu0  ;;  %v444_v59 = vpop.f32.mrb[2].mxu1 }
 0x12e   :  { %v469_v60 = vmul.f32 0.01, %v378_v52  ;;  %v471_v61 = vmul.f32 0.01, %v441_v53  ;;  %v382_v62 = vadd.f32 %v381_v58, %v3562_v43  ;;  %v445_v63 = vadd.f32 %v444_v59, %v3565_v44  ;;  %v383_v0 = vpop.f32.mrb[3].mxu0  ;;  %v446_v1 = vpop.f32.mrb[3].mxu1 }
 0x12f   :  { %v470_v2 = vmul.f32 0.01, %v380_v56  ;;  %v472_v3 = vmul.f32 0.01, %v443_v57  ;;  %v384_v4 = vadd.f32 %v383_v0, %v3568_v45  ;;  %v447_v5 = vadd.f32 %v446_v1, %v3571_v46 }
 0x130   :  { %v473_v6 = vmul.f32 0.01, %v382_v62  ;;  %v475_v7 = vmul.f32 0.01, %v445_v63  ;;  %v3585_v12 = vmax.f32 %v378_v52, %v469_v60  ;;  %v3587_v13 = vmax.f32 %v441_v53, %v471_v61 }
 0x131   :  { %v474_v8 = vmul.f32 0.01, %v384_v4  ;;  %v476_v9 = vmul.f32 0.01, %v447_v5  ;;  %v3593_v16 = vmax.f32 %v380_v56, %v470_v2  ;;  %v3595_v17 = vmax.f32 %v443_v57, %v472_v3 }
 0x132   :  { %v3589_v14 = vmax.f32 %v382_v62, %v473_v6  ;;  %v3591_v15 = vmax.f32 %v445_v63, %v475_v7 }
 0x133   :  { %v3597_v18 = vmax.f32 %v384_v4, %v474_v8  ;;  %v3599_v19 = vmax.f32 %v447_v5, %v476_v9  ;;  %v387_v20 = vpop.f32.mrb[4].mxu0  ;;  %v450_v21 = vpop.f32.mrb[4].mxu1 }
 0x134   :  { %v541_v22 = vadd.f32 %v3589_v14, %v3585_v12  ;;  %v563_v23 = vadd.f32 %v3591_v15, %v3587_v13  ;;  %v388_v24 = vadd.f32 %v387_v20, %v3562_v43  ;;  %v451_v25 = vadd.f32 %v450_v21, %v3565_v44  ;;  %v389_v26 = vpop.f32.mrb[5].mxu0  ;;  %v452_v27 = vpop.f32.mrb[5].mxu1 }
 0x135   :  { %v552_v28 = vadd.f32 %v3597_v18, %v3593_v16  ;;  %v574_v29 = vadd.f32 %v3599_v19, %v3595_v17  ;;  %v390_v30 = vadd.f32 %v389_v26, %v3568_v45  ;;  %v453_v32 = vadd.f32 %v452_v27, %v3571_v46  ;;  %v391_v33 = vpop.f32.mrb[6].mxu0  ;;  %v454_v34 = vpop.f32.mrb[6].mxu1 }
 0x136   :  { %v477_v35 = vmul.f32 0.01, %v388_v24  ;;  %v479_v36 = vmul.f32 0.01, %v451_v25  ;;  %v392_v41 = vadd.f32 %v391_v33, %v3562_v43  ;;  %v455_v42 = vadd.f32 %v454_v34, %v3565_v44  ;;  %v393_v47 = vpop.f32.mrb[7].mxu0  ;;  %v456_v48 = vpop.f32.mrb[7].mxu1 }
 0x137   :  { %v478_v49 = vmul.f32 0.01, %v390_v30  ;;  %v480_v50 = vmul.f32 0.01, %v453_v32  ;;  %v394_v51 = vadd.f32 %v393_v47, %v3568_v45  ;;  %v457_v52 = vadd.f32 %v456_v48, %v3571_v46 }
 0x138   :  { %v3617_v53 = vmax.f32 %v388_v24, %v477_v35  ;;  %v3619_v54 = vmax.f32 %v451_v25, %v479_v36  ;;  %v481_v55 = vmul.f32 0.01, %v392_v41  ;;  %v483_v56 = vmul.f32 0.01, %v455_v42 }
 0x139   :  { %v3621_v57 = vmax.f32 %v390_v30, %v478_v49  ;;  %v3623_v58 = vmax.f32 %v453_v32, %v480_v50  ;;  %v482_v59 = vmul.f32 0.01, %v394_v51  ;;  %v484_v60 = vmul.f32 0.01, %v457_v52 }
 0x13a   :  { %v542_v61 = vadd.f32 %v541_v22, %v3617_v53  ;;  %v564_v62 = vadd.f32 %v563_v23, %v3619_v54  ;;  %v3627_v63 = vmax.f32 %v392_v41, %v481_v55  ;;  %v3629_v0 = vmax.f32 %v455_v42, %v483_v56 }
 0x13b   :  { %v553_v1 = vadd.f32 %v552_v28, %v3621_v57  ;;  %v575_v2 = vadd.f32 %v574_v29, %v3623_v58  ;;  %v3633_v3 = vmax.f32 %v394_v51, %v482_v59  ;;  %v3635_v4 = vmax.f32 %v457_v52, %v484_v60  ;;  %v397_v5 = vpop.f32.mrb[8].mxu0  ;;  %v460_v6 = vpop.f32.mrb[8].mxu1 }
 0x13c   :  { %v543_v7 = vadd.f32 %v542_v61, %v3627_v63  ;;  %v565_v8 = vadd.f32 %v564_v62, %v3629_v0  ;;  %v398_v9 = vadd.f32 %v397_v5, %v3562_v43  ;;  %v461_v10 = vadd.f32 %v460_v6, %v3565_v44  ;;  %v399_v20 = vpop.f32.mrb[9].mxu0  ;;  %v462_v21 = vpop.f32.mrb[9].mxu1 }
 0x13d   :  { %v554_v22 = vadd.f32 %v553_v1, %v3633_v3  ;;  %v576_v23 = vadd.f32 %v575_v2, %v3635_v4  ;;  %v400_v24 = vadd.f32 %v399_v20, %v3568_v45  ;;  %v463_v25 = vadd.f32 %v462_v21, %v3571_v46  ;;  %v401_v26 = vpop.f32.mrb[10].mxu0  ;;  %v464_v27 = vpop.f32.mrb[10].mxu1 }
 0x13e   :  { %v485_v28 = vmul.f32 0.01, %v398_v9  ;;  %v487_v29 = vmul.f32 0.01, %v461_v10  ;;  %v402_v30 = vadd.f32 %v401_v26, %v3562_v43  ;;  %v465_v32 = vadd.f32 %v464_v27, %v3565_v44  ;;  %v403_v33 = vpop.f32.mrb[11].mxu0  ;;  %v466_v34 = vpop.f32.mrb[11].mxu1 }
 0x13f   :  { %v486_v35 = vmul.f32 0.01, %v400_v24  ;;  %v488_v36 = vmul.f32 0.01, %v463_v25  ;;  %v404_v41 = vadd.f32 %v403_v33, %v3568_v45  ;;  %v467_v42 = vadd.f32 %v466_v34, %v3571_v46 }
 0x140   :  { %v3649_v47 = vmax.f32 %v398_v9, %v485_v28  ;;  %v3651_v48 = vmax.f32 %v461_v10, %v487_v29  ;;  %v489_v49 = vmul.f32 0.01, %v402_v30  ;;  %v491_v50 = vmul.f32 0.01, %v465_v32 }
 0x141   :  { %v3653_v51 = vmax.f32 %v400_v24, %v486_v35  ;;  %v3655_v52 = vmax.f32 %v463_v25, %v488_v36  ;;  %v490_v43 = vmul.f32 0.01, %v404_v41  ;;  %v492_v44 = vmul.f32 0.01, %v467_v42 }
 0x142   :  { %v533_v55 = vmul.f32 %v3583_v11, %v3649_v47  ;;  %v535_v45 = vmul.f32 %v3583_v11, %v3651_v48  ;;  %v3661_v56 = vmax.f32 %v402_v30, %v489_v49  ;;  %v3663_v46 = vmax.f32 %v465_v32, %v491_v50 }
 0x143   :  { %4118 = vst [vmem:[#allocation9_spill] sm:$0xff] %v3655_v52  ;;  %v534_v59 = vmul.f32 %v3583_v11, %v3653_v51  ;;  %v536_v60 = vmul.f32 %v3583_v11, %v3655_v52  ;;  %v3669_v61 = vmax.f32 %v404_v41, %v490_v43  ;;  %v3671_v62 = vmax.f32 %v467_v42, %v492_v44 }
 0x144   :  { %v544_v1 = vadd.f32 %v543_v7, %v533_v55  ;;  %v566_v2 = vadd.f32 %v565_v8, %v535_v45  ;;  %v537_v5 = vmul.f32 0.0, %v3661_v56  ;;  %v539_v6 = vmul.f32 0.0, %v3663_v46 }
 0x145   :  { %4119 = vst [vmem:[#allocation10_spill] sm:$0xff] %v3671_v62  ;;  %v555_v9 = vadd.f32 %v554_v22, %v534_v59  ;;  %v577_v10 = vadd.f32 %v576_v23, %v536_v60  ;;  %v538_v20 = vmul.f32 0.0, %v3669_v61  ;;  %v540_v21 = vmul.f32 0.0, %v3671_v62 }
 0x146   :  { %v545_v24 = vadd.f32 %v544_v1, %v537_v5  ;;  %v567_v25 = vadd.f32 %v566_v2, %v539_v6 }
 0x147   :  { %v556_v26 = vadd.f32 %v555_v9, %v538_v20  ;;  %v578_v27 = vadd.f32 %v577_v10, %v540_v21 }
 0x148   :  { %v546_v28 = vrot.slane %v545_v24, 4  ;;  %v568_v29 = vrot.slane %v567_v25, 4 }
 0x149   :  { %v557_v30 = vrot.slane %v556_v26, 4  ;;  %v579_v32 = vrot.slane %v578_v27, 4 }
 0x14a   :  { %v547_v7 = vadd.f32 %v546_v28, %v545_v24  ;;  %v569_v8 = vadd.f32 %v568_v29, %v567_v25 }
 0x14b   :  { %v558_v33 = vadd.f32 %v557_v30, %v556_v26  ;;  %v580_v34 = vadd.f32 %v579_v32, %v578_v27 }
 0x14c   :  { %v548_v35 = vrot.slane %v547_v7, 2  ;;  %v570_v36 = vrot.slane %v569_v8, 2 }
 0x14d   :  { %v559_v22 = vrot.slane %v558_v33, 2  ;;  %v581_v23 = vrot.slane %v580_v34, 2 }
 0x14e   :  { %v549_v41 = vadd.f32 %v548_v35, %v547_v7  ;;  %v571_v42 = vadd.f32 %v570_v36, %v569_v8 }
 0x14f   :  { %v560_v49 = vadd.f32 %v559_v22, %v558_v33  ;;  %v582_v50 = vadd.f32 %v581_v23, %v580_v34 }
 0x150   :  { %v550_v43 = vrot.slane %v549_v41, 1  ;;  %v572_v44 = vrot.slane %v571_v42, 1 }
 0x151   :  { %v561_v55 = vrot.slane %v560_v49, 1  ;;  %v583_v45 = vrot.slane %v582_v50, 1 }
 0x152   :  { %v551_v59 = vadd.f32 %v550_v43, %v549_v41  ;;  %v573_v60 = vadd.f32 %v572_v44, %v571_v42 }
 0x153   :  { %v562_v5 = vadd.f32 %v561_v55, %v560_v49  ;;  %v584_v6 = vadd.f32 %v583_v45, %v582_v50 }
 0x154   :  { %v3677_v1 = vmul.f32 0.027027028, %v551_v59  ;;  %v3679_v2 = vmul.f32 0.027027028, %v573_v60 }
 0x155   :  { %v3697_v30 = vmul.f32 0.027027028, %v562_v5  ;;  %v3708_v49 = vmul.f32 0.027027028, %v584_v6 }
 0x156   :  { %v589_v9 = vsub.f32 %v3585_v12, %v3677_v1  ;;  %v593_v10 = vsub.f32 %v3589_v14, %v3677_v1  ;;  %v597_v20 = vsub.f32 %v3617_v53, %v3677_v1  ;;  %v601_v21 = vsub.f32 %v3627_v63, %v3677_v1 }
 0x157   :  { %v605_v24 = vsub.f32 %v3649_v47, %v3677_v1  ;;  %v609_v25 = vsub.f32 %v3661_v56, %v3677_v1  ;;  %v591_v26 = vsub.f32 %v3587_v13, %v3679_v2  ;;  %v595_v27 = vsub.f32 %v3591_v15, %v3679_v2 }
 0x158   :  { %v637_v28 = vmul.f32 %v589_v9, %v589_v9  ;;  %v641_v29 = vmul.f32 %v593_v10, %v593_v10  ;;  %v645_v7 = vmul.f32 %v597_v20, %v597_v20  ;;  %v599_v8 = vsub.f32 %v3619_v54, %v3679_v2 }
 0x159   :  { %v629_v32 = vmul.f32 %v3583_v11, %v605_v24  ;;  %v603_v33 = vsub.f32 %v3629_v0, %v3679_v2  ;;  %v607_v35 = vsub.f32 %v3651_v48, %v3679_v2  ;;  %v611_v36 = vsub.f32 %v3663_v46, %v3679_v2 }
 0x15a   :  { %v661_v34 = vadd.f32 %v641_v29, %v637_v28  ;;  %v639_v22 = vmul.f32 %v591_v26, %v591_v26  ;;  %v633_v23 = vmul.f32 0.0, %v609_v25  ;;  %v649_v41 = vmul.f32 %v601_v21, %v601_v21 }
 0x15b   :  { %v643_v42 = vmul.f32 %v595_v27, %v595_v27  ;;  %v631_v43 = vmul.f32 %v3583_v11, %v607_v35  ;;  %v635_v44 = vmul.f32 0.0, %v611_v36  ;;  %v647_v55 = vmul.f32 %v599_v8, %v599_v8 }
 0x15c   :  { %v662_v50 = vadd.f32 %v661_v34, %v645_v7  ;;  %v590_v59 = vsub.f32 %v3593_v16, %v3697_v30  ;;  %v594_v60 = vsub.f32 %v3597_v18, %v3697_v30  ;;  %v598_v5 = vsub.f32 %v3621_v57, %v3697_v30 }
 0x15d   :  { %v683_v45 = vadd.f32 %v643_v42, %v639_v22  ;;  %v653_v9 = vmul.f32 %v629_v32, %v629_v32  ;;  %v651_v20 = vmul.f32 %v603_v33, %v603_v33  ;;  %v602_v6 = vsub.f32 %v3633_v3, %v3697_v30 }
 0x15e   :  { %v663_v10 = vadd.f32 %v662_v50, %v649_v41  ;;  %v606_v24 = vsub.f32 %v3653_v51, %v3697_v30  ;;  %v610_v25 = vsub.f32 %v3669_v61, %v3697_v30  ;;  %v638_v26 = vmul.f32 %v590_v59, %v590_v59 }
 0x15f   :  { %v684_v21 = vadd.f32 %v683_v45, %v647_v55  ;;  %v657_v27 = vmul.f32 %v633_v23, %v633_v23  ;;  %v655_v29 = vmul.f32 %v631_v43, %v631_v43  ;;  %v642_v7 = vmul.f32 %v594_v60, %v594_v60 }
 0x160   :  { %v664_v28 = vadd.f32 %v663_v10, %v653_v9  ;;  %v659_v8 = vmul.f32 %v635_v44, %v635_v44  ;;  %v646_v32 = vmul.f32 %v598_v5, %v598_v5  ;;  %v592_v33 = vsub.f32 %v3595_v17, %v3708_v49 }
 0x161   :  { %v685_v34 = vadd.f32 %v684_v21, %v651_v20  ;;  %v630_v36 = vmul.f32 %v3583_v11, %v606_v24  ;;  %v672_v22 = vadd.f32 %v642_v7, %v638_v26  ;;  %v596_v41 = vsub.f32 %v3599_v19, %v3708_v49 }
 0x162   :  { %v665_v35 = vadd.f32 %v664_v28, %v657_v27  ;;  %v634_v50 = vmul.f32 0.0, %v610_v25  ;;  %v650_v55 = vmul.f32 %v602_v6, %v602_v6  ;;  %v600_v23 = vsub.f32 %v3623_v58, %v3708_v49 }
 0x163   :  { %v686_v42 = vadd.f32 %v685_v34, %v655_v29  ;;  %v673_v44 = vadd.f32 %v672_v22, %v646_v32  ;;  %v604_v45 = vsub.f32 %v3635_v4, %v3708_v49  ;;  %v608_v59 = vsub.f32 %v3655_v52, %v3708_v49 }
 0x164   :  { %v666_v43 = vrot.slane %v665_v35, 4  ;;  %v612_v5 = vsub.f32 %v3671_v62, %v3708_v49  ;;  %v640_v9 = vmul.f32 %v592_v33, %v592_v33  ;;  %v644_v10 = vmul.f32 %v596_v41, %v596_v41 }
 0x165   :  { %v687_v60 = vadd.f32 %v686_v42, %v659_v8  ;;  %v654_v21 = vmul.f32 %v630_v36, %v630_v36  ;;  %v674_v6 = vadd.f32 %v673_v44, %v650_v55  ;;  %v632_v25 = vmul.f32 %v3583_v11, %v608_v59 }
 0x166   :  { %v667_v20 = vadd.f32 %v666_v43, %v665_v35  ;;  %v648_v26 = vmul.f32 %v600_v23, %v600_v23  ;;  %v694_v27 = vadd.f32 %v644_v10, %v640_v9  ;;  %v658_v29 = vmul.f32 %v634_v50, %v634_v50 }
 0x167   :  { %v688_v24 = vrot.slane %v687_v60, 4  ;;  %v675_v7 = vadd.f32 %v674_v6, %v654_v21  ;;  %v636_v32 = vmul.f32 0.0, %v612_v5  ;;  %v652_v22 = vmul.f32 %v604_v45, %v604_v45 }
 0x168   :  { %v668_v28 = vrot.slane %v667_v20, 2  ;;  %v695_v8 = vadd.f32 %v694_v27, %v648_v26  ;;  %v656_v33 = vmul.f32 %v632_v25, %v632_v25 }
 0x169   :  { %v689_v34 = vadd.f32 %v688_v24, %v687_v60  ;;  %v676_v52 = vadd.f32 %v675_v7, %v658_v29  ;;  %v660_v43 = vmul.f32 %v636_v32, %v636_v32 }
 0x16a   :  { %v669_v42 = vadd.f32 %v668_v28, %v667_v20  ;;  %v696_v41 = vadd.f32 %v695_v8, %v652_v22  ;;  %v3425_v8 = vmov 1966171168  }
 0x16b   :  { %v690_v62 = vrot.slane %v689_v34, 2  ;;  %v677_v36 = vrot.slane %v676_v52, 4 }
 0x16c   :  { %v670_v35 = vrot.slane %v669_v42, 1  ;;  %v697_v44 = vadd.f32 %v696_v41, %v656_v33 }
 0x16d   :  { %v691_v55 = vadd.f32 %v690_v62, %v689_v34  ;;  %v678_v59 = vadd.f32 %v677_v36, %v676_v52 }
 0x16e   :  { %v671_v23 = vadd.f32 %v670_v35, %v669_v42  ;;  %v698_v10 = vadd.f32 %v697_v44, %v660_v43  ;;  %v725_v42 = vunpack.c.l.s4 %v3425_v8 }
 0x16f   :  { %v692_v9 = vrot.slane %v691_v55, 1  ;;  %v679_v50 = vrot.slane %v678_v59, 2 }
 0x170   :  { %v699_v21 = vrot.slane %v698_v10, 4  ;;  %v705_v5 = vmul.f32 0.027027028, %v671_v23  ;;  %v726_v33 = vunpack.c.0.s8 %v725_v42 }
 0x171   :  { %v680_v60 = vadd.f32 %v679_v50, %v678_v59  ;;  %v693_v45 = vadd.f32 %v692_v9, %v691_v55  ;;  %v709_v50 = vld [vmem:[%s4105_s3] sm:$0xf] }
 0x172   :  { %v700_v6 = vadd.f32 %v699_v21, %v698_v10  ;;  %v710_v25 = vadd.f32 1e-05, %v705_v5  ;;  %v3738_v55 = vsub.s32 %v726_v33, %v3544_v31 }
 0x173   :  { %v681_v20 = vrot.slane %v680_v60, 1  ;;  %v707_v27 = vmul.f32 0.027027028, %v693_v45 }
 0x174   :  { %v701_v24 = vrot.slane %v700_v6, 2  ;;  %3330 = vrsqrt.f32 %v710_v25 }
 0x175   :  { %v682_v26 = vadd.f32 %v681_v20, %v680_v60  ;;  %v712_v52 = vadd.f32 1e-05, %v707_v27 }
 0x176   :  { %v702_v28 = vadd.f32 %v701_v24, %v700_v6 }
 0x177   :  { %v706_v29 = vmul.f32 0.027027028, %v682_v26 }
 0x178   :  { %v703_v62 = vrot.slane %v702_v28, 1 }
 0x179   :  { %v711_v7 = vadd.f32 1e-05, %v706_v29 }
 0x17a   :  { %v704_v34 = vadd.f32 %v703_v62, %v702_v28 }
 0x17b   :  { %3332 = vrsqrt.f32 %v711_v7 }
 0x17c   :  { %v708_v32 = vmul.f32 0.027027028, %v704_v34  ;;  %3334 = vrsqrt.f32 %v712_v52  ;;  %v748_v52 = vld [vmem:[%s4106_s4] sm:$0xf] }
 0x17e   :  { %v713_v22 = vadd.f32 1e-05, %v708_v32  ;;  %v3331_v41 = vpop.eup %3330 }
 0x180   :  { %3336 = vrsqrt.f32 %v713_v22 }
 0x185   :  { %v3333_v35 = vpop.eup %3332 }
 0x186   :  { %v722_v36 = vcombine.low %v3331_v41, %v3333_v35  ;;  %v3335_v43 = vpop.eup %3334 }
 0x188   :  { %v730_v59 = vrot.slane %v722_v36, %v3738_v55 }
 0x18a   :  { %v3337_v44 = vpop.eup %3336 }
 0x18b   :  { %v723_v23 = vcombine.low %v3335_v43, %v3337_v44  ;;  %v3202_v44 = vld [vmem:[#allocation4 + $0x200] ss:$16 sps:$4 sm:$0xff]  }
 0x18d   :  { %v737_v9 = vrot.slane %v723_v23, %v3738_v55 }
 0x18f   :  { %v738_v10 = vcombine.low %v730_v59, %v737_v9  ;;  %v3205_v59 = vld [vmem:[#allocation4 + $0x208] ss:$16 sps:$4 sm:$0xff]  }
 0x191   :  { %v745_v21 = vrot.slane %v738_v10, %v3738_v55 }
 0x193   :  { %v747_v60 = vmul.f32 %v745_v21, %v709_v50 }
 0x195   :  { %v3747_v5 = vrot.slane %v747_v60, %v3550_v37  ;;  %v761_v31 = vrot.slane %v747_v60, %v3553_v38  ;;  %v3751_v45 = vrot.slane %v747_v60, %v3559_v40  ;;  %v757_v6 = vrot.slane %v747_v60, %v3556_v39  ;;  %v3210_v60 = vld [vmem:[#allocation4 + $0x224] ss:$16 sps:$4 sm:$0xff]  }
 0x197   :  { %v773_v20 = vmul.f32 %v3751_v45, %v3708_v49  ;;  %v770_v24 = vmul.f32 %v3747_v5, %v3677_v1  ;;  %v771_v26 = vmul.f32 %v757_v6, %v3697_v30  ;;  %v772_v25 = vmul.f32 %v761_v31, %v3679_v2 }
 0x198   :  { %v805_v1 = vmul.f32 %v757_v6, %v3593_v16  ;;  %v809_v30 = vmul.f32 %v757_v6, %v3597_v18  ;;  %v804_v32 = vmul.f32 %v3747_v5, %v3585_v12  ;;  %v808_v22 = vmul.f32 %v3747_v5, %v3589_v14 }
 0x199   :  { %v778_v27 = vcombine.low %v770_v24, %v771_v26  ;;  %v779_v28 = vcombine.low %v772_v25, %v773_v20  ;;  %v813_v42 = vmul.f32 %v757_v6, %v3621_v57  ;;  %v817_v33 = vmul.f32 %v757_v6, %v3633_v3  ;;  %v3213_v20 = vld [vmem:[#allocation4 + $0x22c] ss:$16 sps:$4 sm:$0xff]  }
 0x19a   :  { %v812_v57 = vmul.f32 %v3747_v5, %v3617_v53  ;;  %v816_v3 = vmul.f32 %v3747_v5, %v3627_v63  ;;  %v821_v9 = vmul.f32 %v757_v6, %v3653_v51  ;;  %v825_v10 = vmul.f32 %v757_v6, %v3669_v61  ;;  %v3211_v61 = vld [vmem:[#allocation4 + $0x228] ss:$16 sps:$4 sm:$0xff]  }
 0x19b   :  { %v786_v29 = vrot.slane %v778_v27, %v3738_v55  ;;  %v793_v62 = vrot.slane %v779_v28, %v3738_v55  ;;  %v806_v50 = vmul.f32 %v761_v31, %v3587_v13  ;;  %v810_v21 = vmul.f32 %v761_v31, %v3591_v15  ;;  %v3208_v13 = vld [vmem:[#allocation4 + $0x220] ss:$16 sps:$4 sm:$0xff]  }
 0x19c   :  { %v814_v24 = vmul.f32 %v761_v31, %v3619_v54  ;;  %v818_v26 = vmul.f32 %v761_v31, %v3629_v0  ;;  %v822_v53 = vmul.f32 %v761_v31, %v3651_v48  ;;  %v826_v27 = vmul.f32 %v761_v31, %v3663_v46  ;;  %v3216_v54 = vld [vmem:[#allocation4 + $0x244] ss:$16 sps:$4 sm:$0xff]   ;;  %v3219_v0 = vld [vmem:[#allocation4 + $0x24c] ss:$16 sps:$4 sm:$0xff]   ;;  %v3217_v46 = vld [vmem:[#allocation4 + $0x248] ss:$16 sps:$4 sm:$0xff]  }
 0x19d   :  { %v794_v7 = vcombine.low %v786_v29, %v793_v62 }
 0x19f   :  { %v801_v49 = vrot.slane %v794_v7, %v3738_v55 }
 0x1a1   :  { %v3766_v34 = vsub.f32 %v748_v52, %v801_v49 }
 0x1a3   :  { %v836_v2 = vrot.slane %v3766_v34, %v3556_v39  ;;  %v3778_v8 = vrot.slane %v3766_v34, %v3550_v37  ;;  %v840_v12 = vrot.slane %v3766_v34, %v3553_v38 }
 0x1a5   :  { %v850_v16 = vadd.f32 %v836_v2, %v805_v1  ;;  %v854_v41 = vadd.f32 %v836_v2, %v809_v30  ;;  %v849_v18 = vadd.f32 %v3778_v8, %v804_v32  ;;  %v853_v35 = vadd.f32 %v3778_v8, %v808_v22  ;;  %v3214_v30 = vld [vmem:[#allocation4 + $0x240] ss:$16 sps:$4 sm:$0xff]   ;;  %v3222_v22 = vld [vmem:[#allocation4 + $0x264] ss:$16 sps:$4 sm:$0xff]  }
 0x1a6   :  { %v858_v36 = vadd.f32 %v836_v2, %v813_v42  ;;  %v862_v43 = vadd.f32 %v836_v2, %v817_v33  ;;  %v851_v51 = vadd.f32 %v840_v12, %v806_v50  ;;  %v855_v25 = vadd.f32 %v840_v12, %v810_v21  ;;  %v3225_v42 = vld [vmem:[#allocation4 + $0x26c] ss:$16 sps:$4 sm:$0xff]   ;;  %v3238_v50 = vld [vmem:[#allocation4 + $0x2c0] ss:$16 sps:$4 sm:$0xff]   ;;  %v3241_v21 = vld [vmem:[#allocation4 + $0x2c8] ss:$16 sps:$4 sm:$0xff]  }
 0x1a7   :  { %v874_v14 = vpack.c.bf16 %v854_v41, %v850_v16  ;;  %v873_v23 = vpack.c.bf16 %v853_v35, %v849_v18  ;;  %v857_v15 = vadd.f32 %v3778_v8, %v812_v57  ;;  %v861_v6 = vadd.f32 %v3778_v8, %v816_v3  ;;  %v3220_v18 = vld [vmem:[#allocation4 + $0x260] ss:$16 sps:$4 sm:$0xff]   ;;  %v3223_v35 = vld [vmem:[#allocation4 + $0x268] ss:$16 sps:$4 sm:$0xff]   ;;  %v3237_v57 = vld [vmem:[#allocation4 + $0x2ac] ss:$16 sps:$4 sm:$0xff]  }
 0x1a8   :  { %v878_v63 = vpack.c.bf16 %v862_v43, %v858_v36  ;;  %v3800_v48 = vpack.c.bf16 %v855_v25, %v851_v51  ;;  %v859_v28 = vadd.f32 %v840_v12, %v814_v24  ;;  %v863_v29 = vadd.f32 %v840_v12, %v818_v26  ;;  %v3231_v43 = vld [vmem:[#allocation4 + $0x28c] ss:$16 sps:$4 sm:$0xff]   ;;  %v3235_v3 = vld [vmem:[#allocation4 + $0x2a8] ss:$16 sps:$4 sm:$0xff]   ;;  %v3244_v24 = vld [vmem:[#allocation4 + $0x2e0] ss:$16 sps:$4 sm:$0xff]  }
 0x1a9   :  { %1707 = vmatprep.mubr.bf16.mxu0 %v874_v14  ;;  %1833 = vmatprep.mubr.bf16.mxu1 %v874_v14  ;;  %v866_v62 = vadd.f32 %v836_v2, %v821_v9  ;;  %v870_v7 = vadd.f32 %v836_v2, %v825_v10  ;;  %v867_v49 = vadd.f32 %v840_v12, %v822_v53  ;;  %v3240_v9 = vld [vmem:[#allocation4 + $0x2c4] ss:$16 sps:$4 sm:$0xff]   ;;  %v3243_v10 = vld [vmem:[#allocation4 + $0x2cc] ss:$16 sps:$4 sm:$0xff]   ;;  %v3247_v26 = vld [vmem:[#allocation4 + $0x2e8] ss:$16 sps:$4 sm:$0xff]  }
 0x1aa   :  { %1708 = vmatmul.mubr.bf16.vlgmr.msra.gmra.mrb[12].mxu0 %v873_v23  ;;  %1834 = vmatmul.mubr.bf16.vlgmr.msra.gmra.mrb[12].mxu1 %v873_v23  ;;  %v3802_v52 = vpack.c.bf16 %v863_v29, %v859_v28  ;;  %v871_v1 = vadd.f32 %v840_v12, %v826_v27  ;;  %v877_v31 = vpack.c.bf16 %v861_v6, %v857_v15  ;;  %v3234_v23 = vld [vmem:[#allocation4 + $0x2a4] ss:$16 sps:$4 sm:$0xff]   ;;  %v3250_v51 = vld [vmem:[#allocation4 + $0x300] ss:$16 sps:$4 sm:$0xff]   ;;  %v3253_v25 = vld [vmem:[#allocation4 + $0x308] ss:$16 sps:$4 sm:$0xff]  }
 0x1ab   :  { %1739 = vmatpush1.bf16.msra.mxu0 %v3202_v44  ;;  %1865 = vmatpush1.bf16.msra.mxu1 %v3205_v59  ;;  %v820_v33 = vmul.f32 %v3747_v5, %v3649_v47  ;;  %v882_v2 = vpack.c.bf16 %v870_v7, %v866_v62  ;;  %v824_v16 = vmul.f32 %v3747_v5, %v3661_v56  ;;  %v3228_v47 = vld [vmem:[#allocation4 + $0x284] ss:$16 sps:$4 sm:$0xff]   ;;  %v3229_v44 = vld [vmem:[#allocation4 + $0x288] ss:$16 sps:$4 sm:$0xff]   ;;  %v3256_v15 = vld [vmem:[#allocation4 + $0x320] ss:$16 sps:$4 sm:$0xff]  }
 0x1ac   :  { %1717 = vmatprep.mubr.bf16.mxu0 %v878_v63  ;;  %1843 = vmatprep.mubr.bf16.mxu1 %v878_v63  ;;  %v3804_v32 = vpack.c.bf16 %v871_v1, %v867_v49  ;;  %v3812_v41 = vrot.slane %v3766_v34, %v3559_v40  ;;  %v807_v36 = vmul.f32 %v3751_v45, %v3595_v17  ;;  %v3226_v17 = vld [vmem:[#allocation4 + $0x280] ss:$16 sps:$4 sm:$0xff]   ;;  %v3252_v53 = vld [vmem:[#allocation4 + $0x304] ss:$16 sps:$4 sm:$0xff]   ;;  %v3255_v63 = vld [vmem:[#allocation4 + $0x30c] ss:$16 sps:$4 sm:$0xff]  }
 0x1ad   :  { %1740 = vmatprep.subr.bf16.mxu0 %v3210_v60  ;;  %1866 = vmatprep.subr.bf16.mxu1 %v3213_v20  ;;  %v865_v12 = vadd.f32 %v3778_v8, %v820_v33  ;;  %v869_v14 = vadd.f32 %v3778_v8, %v824_v16  ;;  %v811_v56 = vmul.f32 %v3751_v45, %v3599_v19  ;;  %v3232_v19 = vld [vmem:[#allocation4 + $0x2a0] ss:$16 sps:$4 sm:$0xff]   ;;  %v3246_v60 = vld [vmem:[#allocation4 + $0x2e4] ss:$16 sps:$4 sm:$0xff]   ;;  %v3249_v20 = vld [vmem:[#allocation4 + $0x2ec] ss:$16 sps:$4 sm:$0xff]  }
 0x1ae   :  { %v852_v5 = vadd.f32 %v3812_v41, %v807_v36  ;;  %v3259_v6 = vld [vmem:[#allocation4 + $0x328] ss:$16 sps:$4 sm:$0xff]   ;;  %v3264_v27 = vld [vmem:[#allocation4 + $0x344] ss:$16 sps:$4 sm:$0xff]   ;;  %v3273_v62 = vld [vmem:[#allocation4 + $0x36c] ss:$16 sps:$4 sm:$0xff]  }
 0x1af   :  { %1741 = vmatpush1.bf16.msra.mxu0 %v3208_v13  ;;  %1867 = vmatpush1.bf16.msra.mxu1 %v3211_v61  ;;  %v856_v34 = vadd.f32 %v3812_v41, %v811_v56  ;;  %v881_v59 = vpack.c.bf16 %v869_v14, %v865_v12  ;;  %v3258_v13 = vld [vmem:[#allocation4 + $0x324] ss:$16 sps:$4 sm:$0xff]   ;;  %v3261_v61 = vld [vmem:[#allocation4 + $0x32c] ss:$16 sps:$4 sm:$0xff]   ;;  %v3265_v28 = vld [vmem:[#allocation4 + $0x348] ss:$16 sps:$4 sm:$0xff]   ;;  %v815_v56 = vmul.f32 %v3751_v45, %v3623_v58 }
 0x1b0   :  { %1742 = vmatprep.subr.bf16.mxu0 %v3216_v54  ;;  %1868 = vmatprep.subr.bf16.mxu1 %v3219_v0  ;;  %v3267_v54 = vld [vmem:[#allocation4 + $0x34c] ss:$16 sps:$4 sm:$0xff]   ;;  %v3262_v0 = vld [vmem:[#allocation4 + $0x340] ss:$16 sps:$4 sm:$0xff]   ;;  %v3270_v29 = vld [vmem:[#allocation4 + $0x364] ss:$16 sps:$4 sm:$0xff]  }
 0x1b1   :  { %v876_v8 = vpack.c.bf16 %v856_v34, %v852_v5  ;;  %v3268_v7 = vld [vmem:[#allocation4 + $0x360] ss:$16 sps:$4 sm:$0xff]   ;;  %v3271_v49 = vld [vmem:[#allocation4 + $0x368] ss:$16 sps:$4 sm:$0xff]   ;;  %v3276_v1 = vld [vmem:[#allocation4 + $0x384] ss:$16 sps:$4 sm:$0xff]   ;;  %v819_v5 = vmul.f32 %v3751_v45, %v3635_v4  ;;  %v860_v34 = vadd.f32 %v3812_v41, %v815_v56 }
 0x1b2   :  { %1718 = vmatmul.mubr.bf16.gmra.mrb[16].mxu0 %v877_v31  ;;  %1844 = vmatmul.mubr.bf16.gmra.mrb[16].mxu1 %v877_v31  ;;  %v3277_v31 = vld [vmem:[#allocation4 + $0x388] ss:$16 sps:$4 sm:$0xff]   ;;  %v3280_v33 = vld [vmem:[#allocation4 + $0x3a0] ss:$16 sps:$4 sm:$0xff]   ;;  %v3288_v16 = vld [vmem:[#allocation4 + $0x3c4] ss:$16 sps:$4 sm:$0xff]  }
 0x1b3   :  { %1743 = vmatpush1.bf16.msra.mxu0 %v3214_v30  ;;  %1869 = vmatpush1.bf16.msra.mxu1 %v3217_v46  ;;  %v3279_v30 = vld [vmem:[#allocation4 + $0x38c] ss:$16 sps:$4 sm:$0xff]   ;;  %v3274_v46 = vld [vmem:[#allocation4 + $0x380] ss:$16 sps:$4 sm:$0xff]   ;;  %v3289_v36 = vld [vmem:[#allocation4 + $0x3c8] ss:$16 sps:$4 sm:$0xff]  }
 0x1b4   :  { %1727 = vmatprep.mubr.bf16.mxu0 %v882_v2  ;;  %1853 = vmatprep.mubr.bf16.mxu1 %v882_v2  ;;  %v3283_v2 = vld [vmem:[#allocation4 + $0x3a8] ss:$16 sps:$4 sm:$0xff]   ;;  %v3292_v12 = vld [vmem:[#allocation4 + $0x3e0] ss:$16 sps:$4 sm:$0xff]  }
 0x1b5   :  { %1744 = vmatprep.subr.bf16.mxu0 %v3222_v22  ;;  %1870 = vmatprep.subr.bf16.mxu1 %v3225_v42  ;;  %v3282_v22 = vld [vmem:[#allocation4 + $0x3a4] ss:$16 sps:$4 sm:$0xff]   ;;  %v3285_v42 = vld [vmem:[#allocation4 + $0x3ac] ss:$16 sps:$4 sm:$0xff]   ;;  %v3295_v14 = vld [vmem:[#allocation4 + $0x3e8] ss:$16 sps:$4 sm:$0xff]  }
 0x1b6   :  { %v4121_v58 = vld [vmem:[#allocation9_spill] sm:$0xff] }
 0x1b7   :  { %1745 = vmatpush1.bf16.msra.mxu0 %v3220_v18  ;;  %1871 = vmatpush1.bf16.msra.mxu1 %v3223_v35  ;;  %v3291_v18 = vld [vmem:[#allocation4 + $0x3cc] ss:$16 sps:$4 sm:$0xff]   ;;  %v3286_v35 = vld [vmem:[#allocation4 + $0x3c0] ss:$16 sps:$4 sm:$0xff]   ;;  %v823_v4 = vmul.f32 %v3751_v45, %v4121_v58 }
 0x1b8   :  { %1746 = vmatprep.subr.bf16.mxu0 %v3228_v47  ;;  %1872 = vmatprep.subr.bf16.mxu1 %v3231_v43  ;;  %v3294_v47 = vld [vmem:[#allocation4 + $0x3e4] ss:$16 sps:$4 sm:$0xff]   ;;  %v3297_v43 = vld [vmem:[#allocation4 + $0x3ec] ss:$16 sps:$4 sm:$0xff]  }
 0x1ba   :  { %1728 = vmatmul.mubr.bf16.gmra.mrb[20].mxu0 %v881_v59  ;;  %1854 = vmatmul.mubr.bf16.gmra.mrb[20].mxu1 %v881_v59  ;;  %v4120_v59 = vld [vmem:[#allocation10_spill] sm:$0xff] }
 0x1bb   :  { %1747 = vmatpush1.bf16.msra.mxu0 %v3226_v17  ;;  %1873 = vmatpush1.bf16.msra.mxu1 %v3229_v44  ;;  %v864_v17 = vadd.f32 %v3812_v41, %v819_v5 }
 0x1bc   :  { %1770 = vmatprep.mubr.bf16.mxu0 %v876_v8  ;;  %1896 = vmatprep.mubr.bf16.mxu1 %v876_v8 }
 0x1bd   :  { %1748 = vmatprep.subr.bf16.mxu0 %v3234_v23  ;;  %1874 = vmatprep.subr.bf16.mxu1 %v3237_v57  ;;  %v880_v44 = vpack.c.bf16 %v864_v17, %v860_v34  ;;  %v827_v23 = vmul.f32 %v3751_v45, %v4120_v59  ;;  %v868_v57 = vadd.f32 %v3812_v41, %v823_v4  ;;  %v3302_v45 = vld [vmem:[#allocation6 + $0x48] sm:$0xff]  }
 0x1bf   :  { %1749 = vmatpush1.bf16.msra.mxu0 %v3232_v19  ;;  %1875 = vmatpush1.bf16.msra.mxu1 %v3235_v3  ;;  %v872_v8 = vadd.f32 %v3812_v41, %v827_v23  ;;  %v3299_v3 = vld [vmem:[#allocation6 + $0xc0] sm:$0xff]   ;;  %v3303_v41 = vld [vmem:[#allocation6 + $0xc8] sm:$0xff]  }
 0x1c0   :  { %1750 = vmatprep.subr.bf16.mxu0 %v3240_v9  ;;  %1876 = vmatprep.subr.bf16.mxu1 %v3243_v10  ;;  %v3300_v9 = vld [vmem:[#allocation6] sm:$0xff]  }
 0x1c1   :  { %v884_v19 = vpack.c.bf16 %v872_v8, %v868_v57  ;;  %v3301_v10 = vld [vmem:[#allocation6 + $0x80] sm:$0xff]  }
 0x1c3   :  { %1751 = vmatpush1.bf16.msra.mxu0 %v3238_v50  ;;  %1877 = vmatpush1.bf16.msra.mxu1 %v3241_v21  ;;  %v3304_v50 = vld [vmem:[#allocation6 + $0x8] sm:$0xff]  }
 0x1c4   :  { %1752 = vmatprep.subr.bf16.mxu0 %v3246_v60  ;;  %1878 = vmatprep.subr.bf16.mxu1 %v3249_v20  ;;  %v3305_v21 = vld [vmem:[#allocation6 + $0x88] sm:$0xff]   ;;  %v3307_v60 = vld [vmem:[#allocation6 + $0xd0] sm:$0xff]  }
 0x1c5   :  { %v3308_v20 = vld [vmem:[#allocation6 + $0x10] sm:$0xff]  }
 0x1c7   :  { %1753 = vmatpush1.bf16.msra.mxu0 %v3244_v24  ;;  %1879 = vmatpush1.bf16.msra.mxu1 %v3247_v26  ;;  %v3310_v24 = vld [vmem:[#allocation6 + $0x58] sm:$0xff]  }
 0x1c8   :  { %1754 = vmatprep.subr.bf16.mxu0 %v3252_v53  ;;  %1880 = vmatprep.subr.bf16.mxu1 %v3255_v63  ;;  %v3311_v26 = vld [vmem:[#allocation6 + $0xd8] sm:$0xff]  }
 0x1c9   :  { %v3312_v53 = vld [vmem:[#allocation6 + $0x18] sm:$0xff]  }
 0x1ca   :  { %v3313_v63 = vld [vmem:[#allocation6 + $0x98] sm:$0xff]  }
 0x1cb   :  { %1755 = vmatpush1.bf16.msra.mxu0 %v3250_v51  ;;  %1881 = vmatpush1.bf16.msra.mxu1 %v3253_v25  ;;  %v3314_v51 = vld [vmem:[#allocation6 + $0x60] sm:$0xff]  }
 0x1cc   :  { %1756 = vmatprep.subr.bf16.mxu0 %v3258_v13  ;;  %1882 = vmatprep.subr.bf16.mxu1 %v3261_v61  ;;  %v3315_v25 = vld [vmem:[#allocation6 + $0xe0] sm:$0xff]  }
 0x1cd   :  { %v3316_v13 = vld [vmem:[#allocation6 + $0x20] sm:$0xff]  }
 0x1ce   :  { %v3317_v61 = vld [vmem:[#allocation6 + $0xa0] sm:$0xff]  }
 0x1cf   :  { %1757 = vmatpush1.bf16.msra.mxu0 %v3256_v15  ;;  %1883 = vmatpush1.bf16.msra.mxu1 %v3259_v6  ;;  %v3318_v15 = vld [vmem:[#allocation6 + $0x68] sm:$0xff]  }
 0x1d0   :  { %1758 = vmatprep.subr.bf16.mxu0 %v3264_v27  ;;  %1884 = vmatprep.subr.bf16.mxu1 %v3267_v54  ;;  %v3319_v6 = vld [vmem:[#allocation6 + $0xe8] sm:$0xff]  }
 0x1d1   :  { %v3320_v27 = vld [vmem:[#allocation6 + $0x28] sm:$0xff]  }
 0x1d2   :  { %v3321_v54 = vld [vmem:[#allocation6 + $0xa8] sm:$0xff]  }
 0x1d3   :  { %1759 = vmatpush1.bf16.msra.mxu0 %v3262_v0  ;;  %1885 = vmatpush1.bf16.msra.mxu1 %v3265_v28  ;;  %v3322_v0 = vld [vmem:[#allocation6 + $0x70] sm:$0xff]  }
 0x1d4   :  { %1760 = vmatprep.subr.bf16.mxu0 %v3270_v29  ;;  %1886 = vmatprep.subr.bf16.mxu1 %v3273_v62  ;;  %v3323_v28 = vld [vmem:[#allocation6 + $0xf0] sm:$0xff]  }
 0x1d5   :  { %v3324_v29 = vld [vmem:[#allocation6 + $0x30] sm:$0xff]  }
 0x1d6   :  { %v3325_v62 = vld [vmem:[#allocation6 + $0xb0] sm:$0xff]  }
 0x1d7   :  { %1761 = vmatpush1.bf16.msra.mxu0 %v3268_v7  ;;  %1887 = vmatpush1.bf16.msra.mxu1 %v3271_v49  ;;  %v3326_v7 = vld [vmem:[#allocation6 + $0x78] sm:$0xff]  }
 0x1d8   :  { %1762 = vmatprep.subr.bf16.mxu0 %v3276_v1  ;;  %1888 = vmatprep.subr.bf16.mxu1 %v3279_v30  ;;  %v3327_v49 = vld [vmem:[#allocation6 + $0xf8] sm:$0xff]   ;;  %v1013_v1 = vld [vmem:[%s4108_s6] sm:$0xf] }
 0x1d9   :  { %v3328_v30 = vld [vmem:[#allocation6 + $0x38] sm:$0xff]  }
 0x1db   :  { %1763 = vmatpush1.bf16.msra.mxu0 %v3274_v46  ;;  %1889 = vmatpush1.bf16.msra.mxu1 %v3277_v31  ;;  %v3329_v46 = vld [vmem:[#allocation6 + $0xb8] sm:$0xff]   ;;  %v3844_v31 = vrot.slane %v1013_v1, %v3550_v37 }
 0x1dc   :  { %1764 = vmatprep.subr.bf16.mxu0 %v3282_v22  ;;  %1890 = vmatprep.subr.bf16.mxu1 %v3285_v42  ;;  %v3847_v22 = vrot.slane %v1013_v1, %v3553_v38  ;;  %v3850_v42 = vrot.slane %v1013_v1, %v3556_v39 }
 0x1df   :  { %1765 = vmatpush1.bf16.msra.mxu0 %v3280_v33  ;;  %1891 = vmatpush1.bf16.msra.mxu1 %v3283_v2  ;;  %v3853_v33 = vrot.slane %v1013_v1, %v3559_v40 }
 0x1e0   :  { %1766 = vmatprep.subr.bf16.mxu0 %v3288_v16  ;;  %1892 = vmatprep.subr.bf16.mxu1 %v3291_v18 }
 0x1e3   :  { %1767 = vmatpush1.bf16.msra.mxu0 %v3286_v35  ;;  %1893 = vmatpush1.bf16.msra.mxu1 %v3289_v36 }
 0x1e4   :  { %1768 = vmatprep.subr.bf16.mxu0 %v3294_v47  ;;  %1894 = vmatprep.subr.bf16.mxu1 %v3297_v43 }
 0x1e7   :  { %1769 = vmatpush1.bf16.msra.mxu0 %v3292_v12  ;;  %1895 = vmatpush1.bf16.msra.mxu1 %v3295_v14 }
 0x1e8   :  { %2963 = vmatprep.subr.bf16.mxu1 %v3299_v3 }
 0x1ea   :  { %1771 = vmatmul.mubr.bf16.vlgmr.msra.gmra.mrb[12].mxu0 %v3800_v48  ;;  %1897 = vmatmul.mubr.bf16.vlgmr.msra.gmra.mrb[12].mxu1 %v3800_v48  ;;  %v3298_v48 = vld [vmem:[#allocation6 + $0x40] sm:$0xff]  }
 0x1eb   :  { %1780 = vmatprep.mubr.bf16.mxu0 %v880_v44  ;;  %1906 = vmatprep.mubr.bf16.mxu1 %v880_v44 }
 0x1ec   :  { %2929 = vmatprep.subr.bf16.mxu0 %v3298_v48  ;;  %2964 = vmatpush3.bf16.msra.mxu1 %v3301_v10 }
 0x1ed   :  { %2930 = vmatpush3.bf16.msra.mxu0 %v3300_v9  ;;  %2965 = vmatprep.subr.bf16.mxu1 %v3303_v41 }
 0x1ee   :  { %2931 = vmatprep.subr.bf16.mxu0 %v3302_v45 }
 0x1f0   :  { %2966 = vmatpush3.bf16.msra.mxu1 %v3305_v21 }
 0x1f1   :  { %2932 = vmatpush3.bf16.msra.mxu0 %v3304_v50  ;;  %2967 = vmatprep.subr.bf16.mxu1 %v3307_v60 }
 0x1f2   :  { %1781 = vmatmul.mubr.bf16.gmra.mrb[16].mxu0 %v3802_v52  ;;  %1907 = vmatmul.mubr.bf16.gmra.mrb[16].mxu1 %v3802_v52  ;;  %v3306_v52 = vld [vmem:[#allocation6 + $0x50] sm:$0xff]  }
 0x1f3   :  { %1790 = vmatprep.mubr.bf16.mxu0 %v884_v19  ;;  %1916 = vmatprep.mubr.bf16.mxu1 %v884_v19 }
 0x1f4   :  { %2933 = vmatprep.subr.bf16.mxu0 %v3306_v52 }
 0x1f5   :  { %2934 = vmatpush3.bf16.msra.mxu0 %v3308_v20 }
 0x1f6   :  { %2935 = vmatprep.subr.bf16.mxu0 %v3310_v24 }
 0x1f9   :  { %2936 = vmatpush3.bf16.msra.mxu0 %v3312_v53 }
 0x1fa   :  { %1791 = vmatmul.mubr.bf16.gmra.mrb[20].mxu0 %v3804_v32  ;;  %1917 = vmatmul.mubr.bf16.gmra.mrb[20].mxu1 %v3804_v32  ;;  %v3309_v32 = vld [vmem:[#allocation6 + $0x90] sm:$0xff]  }
 0x1fb   :  { %2968 = vmatpush3.bf16.msra.mxu1 %v3309_v32  ;;  %2937 = vmatprep.subr.bf16.mxu0 %v3314_v51 }
 0x1fc   :  { %2969 = vmatprep.subr.bf16.mxu1 %v3311_v26 }
 0x1fd   :  { %2938 = vmatpush3.bf16.msra.mxu0 %v3316_v13 }
 0x1fe   :  { %2939 = vmatprep.subr.bf16.mxu0 %v3318_v15 }
 0x1ff   :  { %2970 = vmatpush3.bf16.msra.mxu1 %v3313_v63 }
 0x200   :  { %2971 = vmatprep.subr.bf16.mxu1 %v3315_v25 }
 0x201   :  { %2940 = vmatpush3.bf16.msra.mxu0 %v3320_v27 }
 0x202   :  { %2941 = vmatprep.subr.bf16.mxu0 %v3322_v0 }
 0x203   :  { %2972 = vmatpush3.bf16.msra.mxu1 %v3317_v61 }
 0x204   :  { %2973 = vmatprep.subr.bf16.mxu1 %v3319_v6 }
 0x205   :  { %2942 = vmatpush3.bf16.msra.mxu0 %v3324_v29 }
 0x206   :  { %2943 = vmatprep.subr.bf16.mxu0 %v3326_v7 }
 0x207   :  { %2974 = vmatpush3.bf16.msra.mxu1 %v3321_v54 }
 0x208   :  { %2975 = vmatprep.subr.bf16.mxu1 %v3323_v28 }
 0x209   :  { %2944 = vmatpush3.bf16.msra.mxu0 %v3328_v30 }
 0x20b   :  { %2976 = vmatpush3.bf16.msra.mxu1 %v3325_v62 }
 0x20c   :  { %2977 = vmatprep.subr.bf16.mxu1 %v3327_v49 }
 0x20f   :  { %2978 = vmatpush3.bf16.msra.mxu1 %v3329_v46 }
 0x2bd   :  { %v1772_v2 = vpop.f32.mrb[12].mxu0  ;;  %v1898_v16 = vpop.f32.mrb[12].mxu1 }
 0x2be   :  { %v2997_v18 = vadd.f32 %v1772_v2, %v3844_v31  ;;  %v3009_v35 = vadd.f32 %v1898_v16, %v3847_v22  ;;  %v1774_v36 = vpop.f32.mrb[13].mxu0  ;;  %v1900_v47 = vpop.f32.mrb[13].mxu1 }
 0x2bf   :  { %v2998_v43 = vadd.f32 %v1774_v36, %v3850_v42  ;;  %v3010_v12 = vadd.f32 %v1900_v47, %v3853_v33  ;;  %v1776_v14 = vpop.f32.mrb[14].mxu0  ;;  %v1902_v56 = vpop.f32.mrb[14].mxu1 }
 0x2c0   :  { %v1927_v5 = vmul.f32 0.01, %v2997_v18  ;;  %v1929_v34 = vmul.f32 0.01, %v3009_v35  ;;  %v2999_v17 = vadd.f32 %v1776_v14, %v3844_v31  ;;  %v3011_v44 = vadd.f32 %v1902_v56, %v3847_v22  ;;  %v1778_v59 = vpop.f32.mrb[15].mxu0  ;;  %v1904_v23 = vpop.f32.mrb[15].mxu1 }
 0x2c1   :  { %v1928_v58 = vmul.f32 0.01, %v2998_v43  ;;  %v1930_v4 = vmul.f32 0.01, %v3010_v12  ;;  %v3000_v57 = vadd.f32 %v1778_v59, %v3850_v42  ;;  %v3012_v8 = vadd.f32 %v1904_v23, %v3853_v33 }
 0x2c2   :  { %v1931_v19 = vmul.f32 0.01, %v2999_v17  ;;  %v1933_v48 = vmul.f32 0.01, %v3011_v44  ;;  %v3863_v10 = vmax.f32 %v2997_v18, %v1927_v5  ;;  %v3865_v45 = vmax.f32 %v3009_v35, %v1929_v34 }
 0x2c3   :  { %v1932_v3 = vmul.f32 0.01, %v3000_v57  ;;  %v1934_v9 = vmul.f32 0.01, %v3012_v8  ;;  %v3871_v21 = vmax.f32 %v2998_v43, %v1928_v58  ;;  %v3873_v52 = vmax.f32 %v3010_v12, %v1930_v4 }
 0x2c4   :  { %v3867_v41 = vmax.f32 %v2999_v17, %v1931_v19  ;;  %v3869_v50 = vmax.f32 %v3011_v44, %v1933_v48 }
 0x2c5   :  { %v3875_v60 = vmax.f32 %v3000_v57, %v1932_v3  ;;  %v3877_v20 = vmax.f32 %v3012_v8, %v1934_v9  ;;  %v1782_v32 = vpop.f32.mrb[16].mxu0  ;;  %v1908_v24 = vpop.f32.mrb[16].mxu1 }
 0x2c6   :  { %v1999_v26 = vadd.f32 %v3867_v41, %v3863_v10  ;;  %v2021_v53 = vadd.f32 %v3869_v50, %v3865_v45  ;;  %v3001_v63 = vadd.f32 %v1782_v32, %v3844_v31  ;;  %v3013_v51 = vadd.f32 %v1908_v24, %v3847_v22  ;;  %v1784_v25 = vpop.f32.mrb[17].mxu0  ;;  %v1910_v13 = vpop.f32.mrb[17].mxu1 }
 0x2c7   :  { %v2010_v61 = vadd.f32 %v3875_v60, %v3871_v21  ;;  %v2032_v15 = vadd.f32 %v3877_v20, %v3873_v52  ;;  %v3002_v6 = vadd.f32 %v1784_v25, %v3850_v42  ;;  %v3014_v27 = vadd.f32 %v1910_v13, %v3853_v33  ;;  %v1786_v54 = vpop.f32.mrb[18].mxu0  ;;  %v1912_v0 = vpop.f32.mrb[18].mxu1 }
 0x2c8   :  { %v1935_v28 = vmul.f32 0.01, %v3001_v63  ;;  %v1937_v29 = vmul.f32 0.01, %v3013_v51  ;;  %v3003_v62 = vadd.f32 %v1786_v54, %v3844_v31  ;;  %v3015_v7 = vadd.f32 %v1912_v0, %v3847_v22  ;;  %v1788_v49 = vpop.f32.mrb[19].mxu0  ;;  %v1914_v1 = vpop.f32.mrb[19].mxu1 }
 0x2c9   :  { %v1936_v30 = vmul.f32 0.01, %v3002_v6  ;;  %v1938_v46 = vmul.f32 0.01, %v3014_v27  ;;  %v3004_v2 = vadd.f32 %v1788_v49, %v3850_v42  ;;  %v3016_v16 = vadd.f32 %v1914_v1, %v3853_v33 }
 0x2ca   :  { %v3895_v18 = vmax.f32 %v3001_v63, %v1935_v28  ;;  %v3897_v35 = vmax.f32 %v3013_v51, %v1937_v29  ;;  %v1939_v36 = vmul.f32 0.01, %v3003_v62  ;;  %v1941_v47 = vmul.f32 0.01, %v3015_v7 }
 0x2cb   :  { %v3899_v43 = vmax.f32 %v3002_v6, %v1936_v30  ;;  %v3901_v12 = vmax.f32 %v3014_v27, %v1938_v46  ;;  %v1940_v14 = vmul.f32 0.01, %v3004_v2  ;;  %v1942_v56 = vmul.f32 0.01, %v3016_v16 }
 0x2cc   :  { %v2000_v5 = vadd.f32 %v1999_v26, %v3895_v18  ;;  %v2022_v34 = vadd.f32 %v2021_v53, %v3897_v35  ;;  %v3905_v17 = vmax.f32 %v3003_v62, %v1939_v36  ;;  %v3907_v44 = vmax.f32 %v3015_v7, %v1941_v47 }
 0x2cd   :  { %v2011_v59 = vadd.f32 %v2010_v61, %v3899_v43  ;;  %v2033_v23 = vadd.f32 %v2032_v15, %v3901_v12  ;;  %v3911_v58 = vmax.f32 %v3004_v2, %v1940_v14  ;;  %v3913_v4 = vmax.f32 %v3016_v16, %v1942_v56  ;;  %v1792_v57 = vpop.f32.mrb[20].mxu0  ;;  %v1918_v8 = vpop.f32.mrb[20].mxu1 }
 0x2ce   :  { %v2001_v19 = vadd.f32 %v2000_v5, %v3905_v17  ;;  %v2023_v48 = vadd.f32 %v2022_v34, %v3907_v44  ;;  %v3005_v3 = vadd.f32 %v1792_v57, %v3844_v31  ;;  %v3017_v9 = vadd.f32 %v1918_v8, %v3847_v22  ;;  %v1794_v32 = vpop.f32.mrb[21].mxu0  ;;  %v1920_v24 = vpop.f32.mrb[21].mxu1 }
 0x2cf   :  { %v2012_v26 = vadd.f32 %v2011_v59, %v3911_v58  ;;  %v2034_v53 = vadd.f32 %v2033_v23, %v3913_v4  ;;  %v3006_v63 = vadd.f32 %v1794_v32, %v3850_v42  ;;  %v3018_v51 = vadd.f32 %v1920_v24, %v3853_v33  ;;  %v1796_v25 = vpop.f32.mrb[22].mxu0  ;;  %v1922_v13 = vpop.f32.mrb[22].mxu1 }
 0x2d0   :  { %v1943_v61 = vmul.f32 0.01, %v3005_v3  ;;  %v1945_v15 = vmul.f32 0.01, %v3017_v9  ;;  %v3007_v6 = vadd.f32 %v1796_v25, %v3844_v31  ;;  %v3019_v27 = vadd.f32 %v1922_v13, %v3847_v22  ;;  %v1798_v54 = vpop.f32.mrb[23].mxu0  ;;  %v1924_v0 = vpop.f32.mrb[23].mxu1 }
 0x2d1   :  { %v1944_v28 = vmul.f32 0.01, %v3006_v63  ;;  %v1946_v29 = vmul.f32 0.01, %v3018_v51  ;;  %v3008_v62 = vadd.f32 %v1798_v54, %v3850_v42  ;;  %v3020_v7 = vadd.f32 %v1924_v0, %v3853_v33 }
 0x2d2   :  { %v3927_v49 = vmax.f32 %v3005_v3, %v1943_v61  ;;  %v3929_v1 = vmax.f32 %v3017_v9, %v1945_v15  ;;  %v1947_v30 = vmul.f32 0.01, %v3007_v6  ;;  %v1949_v46 = vmul.f32 0.01, %v3019_v27 }
 0x2d3   :  { %v3931_v2 = vmax.f32 %v3006_v63, %v1944_v28  ;;  %v3933_v16 = vmax.f32 %v3018_v51, %v1946_v29  ;;  %v1948_v31 = vmul.f32 0.01, %v3008_v62  ;;  %v1950_v22 = vmul.f32 0.01, %v3020_v7 }
 0x2d4   :  { %4122 = vst [vmem:[#allocation10_spill] sm:$0xff] %v3929_v1  ;;  %v1991_v36 = vmul.f32 %v3583_v11, %v3927_v49  ;;  %v1993_v42 = vmul.f32 %v3583_v11, %v3929_v1  ;;  %v3939_v47 = vmax.f32 %v3007_v6, %v1947_v30  ;;  %v3941_v33 = vmax.f32 %v3019_v27, %v1949_v46 }
 0x2d5   :  { %v1992_v14 = vmul.f32 %v3583_v11, %v3931_v2  ;;  %v1994_v56 = vmul.f32 %v3583_v11, %v3933_v16  ;;  %v3947_v5 = vmax.f32 %v3008_v62, %v1948_v31  ;;  %v3949_v34 = vmax.f32 %v3020_v7, %v1950_v22 }
 0x2d6   :  { %4123 = vst [vmem:[#allocation9_spill] sm:$0xff] %v3941_v33  ;;  %v2002_v59 = vadd.f32 %v2001_v19, %v1991_v36  ;;  %v2024_v23 = vadd.f32 %v2023_v48, %v1993_v42  ;;  %v1995_v57 = vmul.f32 0.0, %v3939_v47  ;;  %v1997_v8 = vmul.f32 0.0, %v3941_v33 }
 0x2d7   :  { %v2013_v3 = vadd.f32 %v2012_v26, %v1992_v14  ;;  %v2035_v9 = vadd.f32 %v2034_v53, %v1994_v56  ;;  %v1996_v32 = vmul.f32 0.0, %v3947_v5  ;;  %v1998_v24 = vmul.f32 0.0, %v3949_v34 }
 0x2d8   :  { %v2003_v63 = vadd.f32 %v2002_v59, %v1995_v57  ;;  %v2025_v51 = vadd.f32 %v2024_v23, %v1997_v8 }
 0x2d9   :  { %v2014_v25 = vadd.f32 %v2013_v3, %v1996_v32  ;;  %v2036_v13 = vadd.f32 %v2035_v9, %v1998_v24 }
 0x2da   :  { %v2004_v61 = vrot.slane %v2003_v63, 4  ;;  %v2026_v15 = vrot.slane %v2025_v51, 4 }
 0x2db   :  { %v2015_v6 = vrot.slane %v2014_v25, 4  ;;  %v2037_v27 = vrot.slane %v2036_v13, 4 }
 0x2dc   :  { %v2005_v19 = vadd.f32 %v2004_v61, %v2003_v63  ;;  %v2027_v48 = vadd.f32 %v2026_v15, %v2025_v51 }
 0x2dd   :  { %v2016_v54 = vadd.f32 %v2015_v6, %v2014_v25  ;;  %v2038_v0 = vadd.f32 %v2037_v27, %v2036_v13 }
 0x2de   :  { %v2006_v28 = vrot.slane %v2005_v19, 2  ;;  %v2028_v29 = vrot.slane %v2027_v48, 2 }
 0x2df   :  { %v2017_v26 = vrot.slane %v2016_v54, 2  ;;  %v2039_v53 = vrot.slane %v2038_v0, 2 }
 0x2e0   :  { %v2007_v62 = vadd.f32 %v2006_v28, %v2005_v19  ;;  %v2029_v7 = vadd.f32 %v2028_v29, %v2027_v48 }
 0x2e1   :  { %v2018_v30 = vadd.f32 %v2017_v26, %v2016_v54  ;;  %v2040_v46 = vadd.f32 %v2039_v53, %v2038_v0 }
 0x2e2   :  { %v2008_v31 = vrot.slane %v2007_v62, 1  ;;  %v2030_v22 = vrot.slane %v2029_v7, 1 }
 0x2e3   :  { %v2019_v36 = vrot.slane %v2018_v30, 1  ;;  %v2041_v42 = vrot.slane %v2040_v46, 1 }
 0x2e4   :  { %v2009_v14 = vadd.f32 %v2008_v31, %v2007_v62  ;;  %v2031_v56 = vadd.f32 %v2030_v22, %v2029_v7 }
 0x2e5   :  { %v2020_v57 = vadd.f32 %v2019_v36, %v2018_v30  ;;  %v2042_v8 = vadd.f32 %v2041_v42, %v2040_v46 }
 0x2e6   :  { %v3955_v59 = vmul.f32 0.027027028, %v2009_v14  ;;  %v3957_v23 = vmul.f32 0.027027028, %v2031_v56 }
 0x2e7   :  { %v3975_v6 = vmul.f32 0.027027028, %v2020_v57  ;;  %v3986_v30 = vmul.f32 0.027027028, %v2042_v8 }
 0x2e8   :  { %v2047_v3 = vsub.f32 %v3863_v10, %v3955_v59  ;;  %v2051_v9 = vsub.f32 %v3867_v41, %v3955_v59  ;;  %v2055_v32 = vsub.f32 %v3895_v18, %v3955_v59  ;;  %v2059_v24 = vsub.f32 %v3905_v17, %v3955_v59 }
 0x2e9   :  { %v2063_v63 = vsub.f32 %v3927_v49, %v3955_v59  ;;  %v2067_v51 = vsub.f32 %v3939_v47, %v3955_v59  ;;  %v2049_v25 = vsub.f32 %v3865_v45, %v3957_v23  ;;  %v2053_v13 = vsub.f32 %v3869_v50, %v3957_v23 }
 0x2ea   :  { %v2095_v61 = vmul.f32 %v2047_v3, %v2047_v3  ;;  %v2099_v15 = vmul.f32 %v2051_v9, %v2051_v9  ;;  %v2103_v19 = vmul.f32 %v2055_v32, %v2055_v32  ;;  %v2057_v48 = vsub.f32 %v3897_v35, %v3957_v23 }
 0x2eb   :  { %v2087_v27 = vmul.f32 %v3583_v11, %v2063_v63  ;;  %v2061_v54 = vsub.f32 %v3907_v44, %v3957_v23  ;;  %v2065_v28 = vsub.f32 %v3929_v1, %v3957_v23  ;;  %v2069_v29 = vsub.f32 %v3941_v33, %v3957_v23 }
 0x2ec   :  { %v2119_v0 = vadd.f32 %v2099_v15, %v2095_v61  ;;  %v2097_v26 = vmul.f32 %v2049_v25, %v2049_v25  ;;  %v2091_v53 = vmul.f32 0.0, %v2067_v51  ;;  %v2107_v62 = vmul.f32 %v2059_v24, %v2059_v24 }
 0x2ed   :  { %v2101_v7 = vmul.f32 %v2053_v13, %v2053_v13  ;;  %v2089_v31 = vmul.f32 %v3583_v11, %v2065_v28  ;;  %v2093_v22 = vmul.f32 0.0, %v2069_v29  ;;  %v2105_v36 = vmul.f32 %v2057_v48, %v2057_v48 }
 0x2ee   :  { %v2120_v46 = vadd.f32 %v2119_v0, %v2103_v19  ;;  %v2048_v14 = vsub.f32 %v3871_v21, %v3975_v6  ;;  %v2052_v56 = vsub.f32 %v3875_v60, %v3975_v6  ;;  %v2056_v57 = vsub.f32 %v3899_v43, %v3975_v6 }
 0x2ef   :  { %v2141_v42 = vadd.f32 %v2101_v7, %v2097_v26  ;;  %v2111_v3 = vmul.f32 %v2087_v27, %v2087_v27  ;;  %v2109_v32 = vmul.f32 %v2061_v54, %v2061_v54  ;;  %v2060_v8 = vsub.f32 %v3911_v58, %v3975_v6 }
 0x2f0   :  { %v2121_v9 = vadd.f32 %v2120_v46, %v2107_v62  ;;  %v2064_v63 = vsub.f32 %v3931_v2, %v3975_v6  ;;  %v2068_v51 = vsub.f32 %v3947_v5, %v3975_v6  ;;  %v2096_v25 = vmul.f32 %v2048_v14, %v2048_v14 }
 0x2f1   :  { %v2142_v24 = vadd.f32 %v2141_v42, %v2105_v36  ;;  %v2115_v13 = vmul.f32 %v2091_v53, %v2091_v53  ;;  %v2113_v15 = vmul.f32 %v2089_v31, %v2089_v31  ;;  %v2100_v19 = vmul.f32 %v2052_v56, %v2052_v56 }
 0x2f2   :  { %v2122_v61 = vadd.f32 %v2121_v9, %v2111_v3  ;;  %v2117_v48 = vmul.f32 %v2093_v22, %v2093_v22  ;;  %v2104_v27 = vmul.f32 %v2056_v57, %v2056_v57  ;;  %v2050_v54 = vsub.f32 %v3873_v52, %v3986_v30 }
 0x2f3   :  { %v2143_v0 = vadd.f32 %v2142_v24, %v2109_v32  ;;  %v2088_v29 = vmul.f32 %v3583_v11, %v2064_v63  ;;  %v2130_v26 = vadd.f32 %v2100_v19, %v2096_v25  ;;  %v2054_v62 = vsub.f32 %v3877_v20, %v3986_v30 }
 0x2f4   :  { %v2123_v28 = vadd.f32 %v2122_v61, %v2115_v13  ;;  %v2092_v46 = vmul.f32 0.0, %v2068_v51  ;;  %v2108_v36 = vmul.f32 %v2060_v8, %v2060_v8  ;;  %v2058_v53 = vsub.f32 %v3901_v12, %v3986_v30 }
 0x2f5   :  { %v2144_v7 = vadd.f32 %v2143_v0, %v2113_v15  ;;  %v2131_v22 = vadd.f32 %v2130_v26, %v2104_v27  ;;  %v2062_v42 = vsub.f32 %v3913_v4, %v3986_v30  ;;  %v2066_v14 = vsub.f32 %v3933_v16, %v3986_v30 }
 0x2f6   :  { %v2124_v31 = vrot.slane %v2123_v28, 4  ;;  %v2070_v57 = vsub.f32 %v3949_v34, %v3986_v30  ;;  %v2098_v3 = vmul.f32 %v2050_v54, %v2050_v54  ;;  %v2102_v9 = vmul.f32 %v2054_v62, %v2054_v62 }
 0x2f7   :  { %v2145_v56 = vadd.f32 %v2144_v7, %v2117_v48  ;;  %v2112_v24 = vmul.f32 %v2088_v29, %v2088_v29  ;;  %v2132_v8 = vadd.f32 %v2131_v22, %v2108_v36  ;;  %v2090_v51 = vmul.f32 %v3583_v11, %v2066_v14 }
 0x2f8   :  { %v2125_v32 = vadd.f32 %v2124_v31, %v2123_v28  ;;  %v2106_v25 = vmul.f32 %v2058_v53, %v2058_v53  ;;  %v2152_v13 = vadd.f32 %v2102_v9, %v2098_v3  ;;  %v2116_v15 = vmul.f32 %v2092_v46, %v2092_v46 }
 0x2f9   :  { %v2146_v63 = vrot.slane %v2145_v56, 4  ;;  %v2133_v19 = vadd.f32 %v2132_v8, %v2112_v24  ;;  %v2094_v27 = vmul.f32 0.0, %v2070_v57  ;;  %v2110_v26 = vmul.f32 %v2062_v42, %v2062_v42 }
 0x2fa   :  { %v2126_v61 = vrot.slane %v2125_v32, 2  ;;  %v2153_v48 = vadd.f32 %v2152_v13, %v2106_v25  ;;  %v2114_v54 = vmul.f32 %v2090_v51, %v2090_v51 }
 0x2fb   :  { %v2147_v0 = vadd.f32 %v2146_v63, %v2145_v56  ;;  %v2134_v33 = vadd.f32 %v2133_v19, %v2116_v15  ;;  %v2118_v31 = vmul.f32 %v2094_v27, %v2094_v27 }
 0x2fc   :  { %v2127_v7 = vadd.f32 %v2126_v61, %v2125_v32  ;;  %v2154_v62 = vadd.f32 %v2153_v48, %v2110_v26 }
 0x2fd   :  { %v2148_v1 = vrot.slane %v2147_v0, 2  ;;  %v2135_v29 = vrot.slane %v2134_v33, 4 }
 0x2fe   :  { %v2128_v28 = vrot.slane %v2127_v7, 1  ;;  %v2155_v22 = vadd.f32 %v2154_v62, %v2114_v54 }
 0x2ff   :  { %v2149_v36 = vadd.f32 %v2148_v1, %v2147_v0  ;;  %v2136_v11 = vadd.f32 %v2135_v29, %v2134_v33 }
 0x300   :  { %v2129_v53 = vadd.f32 %v2128_v28, %v2127_v7  ;;  %v2156_v3 = vadd.f32 %v2155_v22, %v2118_v31  ;;  %v2167_v22 = vld [vmem:[%s4109_s7] sm:$0xf] }
 0x301   :  { %v2150_v14 = vrot.slane %v2149_v36, 1  ;;  %v2137_v46 = vrot.slane %v2136_v11, 2 }
 0x302   :  { %v2157_v9 = vrot.slane %v2156_v3, 4  ;;  %v2163_v57 = vmul.f32 0.027027028, %v2129_v53 }
 0x303   :  { %v2138_v56 = vadd.f32 %v2137_v46, %v2136_v11  ;;  %v2151_v42 = vadd.f32 %v2150_v14, %v2149_v36 }
 0x304   :  { %v2158_v24 = vadd.f32 %v2157_v9, %v2156_v3  ;;  %v2168_v51 = vadd.f32 1e-05, %v2163_v57 }
 0x305   :  { %v2139_v32 = vrot.slane %v2138_v56, 1  ;;  %v2165_v25 = vmul.f32 0.027027028, %v2151_v42 }
 0x306   :  { %v2159_v8 = vrot.slane %v2158_v24, 2  ;;  %3338 = vrsqrt.f32 %v2168_v51 }
 0x307   :  { %v2140_v63 = vadd.f32 %v2139_v32, %v2138_v56  ;;  %v2170_v33 = vadd.f32 1e-05, %v2165_v25 }
 0x308   :  { %v2160_v13 = vadd.f32 %v2159_v8, %v2158_v24 }
 0x309   :  { %v2164_v61 = vmul.f32 0.027027028, %v2140_v63 }
 0x30a   :  { %v2161_v1 = vrot.slane %v2160_v13, 1 }
 0x30b   :  { %v2169_v15 = vadd.f32 1e-05, %v2164_v61 }
 0x30c   :  { %v2162_v19 = vadd.f32 %v2161_v1, %v2160_v13  ;;  %v2206_v13 = vld [vmem:[%s4110_s8] sm:$0xf] }
 0x30d   :  { %3340 = vrsqrt.f32 %v2169_v15 }
 0x30e   :  { %v2166_v0 = vmul.f32 0.027027028, %v2162_v19  ;;  %3342 = vrsqrt.f32 %v2170_v33 }
 0x310   :  { %v2171_v27 = vadd.f32 1e-05, %v2166_v0  ;;  %v3339_v26 = vpop.eup %3338 }
 0x312   :  { %3344 = vrsqrt.f32 %v2171_v27 }
 0x317   :  { %v3341_v48 = vpop.eup %3340 }
 0x318   :  { %v2180_v7 = vcombine.low %v3339_v26, %v3341_v48  ;;  %v3343_v54 = vpop.eup %3342 }
 0x31a   :  { %v2188_v28 = vrot.slane %v2180_v7, %v3738_v55 }
 0x31c   :  { %v3345_v62 = vpop.eup %3344 }
 0x31d   :  { %v2181_v29 = vcombine.low %v3343_v54, %v3345_v62 }
 0x31f   :  { %v2195_v36 = vrot.slane %v2181_v29, %v3738_v55 }
 0x321   :  { %v2196_v31 = vcombine.low %v2188_v28, %v2195_v36 }
 0x323   :  { %v2203_v11 = vrot.slane %v2196_v31, %v3738_v55 }
 0x325   :  { %v2205_v53 = vmul.f32 %v2203_v11, %v2167_v22 }
 0x327   :  { %v4022_v14 = vrot.slane %v2205_v53, %v3550_v37  ;;  %v4025_v3 = vrot.slane %v2205_v53, %v3553_v38  ;;  %v2223_v46 = vrot.slane %v2205_v53, %v3559_v40  ;;  %v2215_v9 = vrot.slane %v2205_v53, %v3556_v39 }
 0x329   :  { %v2231_v56 = vmul.f32 %v2223_v46, %v3986_v30  ;;  %v2228_v57 = vmul.f32 %v4022_v14, %v3955_v59  ;;  %v2229_v42 = vmul.f32 %v2215_v9, %v3975_v6  ;;  %v2230_v24 = vmul.f32 %v4025_v3, %v3957_v23 }
 0x32a   :  { %v2263_v59 = vmul.f32 %v2215_v9, %v3871_v21  ;;  %v2267_v6 = vmul.f32 %v2215_v9, %v3875_v60  ;;  %v2265_v23 = vmul.f32 %v2223_v46, %v3873_v52  ;;  %v2269_v1 = vmul.f32 %v2223_v46, %v3877_v20 }
 0x32b   :  { %v2236_v32 = vcombine.low %v2228_v57, %v2229_v42  ;;  %v2237_v8 = vcombine.low %v2230_v24, %v2231_v56  ;;  %v2262_v15 = vmul.f32 %v4022_v14, %v3863_v10  ;;  %v2266_v33 = vmul.f32 %v4022_v14, %v3867_v41 }
 0x32c   :  { %v2264_v19 = vmul.f32 %v4025_v3, %v3865_v45  ;;  %v2271_v0 = vmul.f32 %v2215_v9, %v3899_v43  ;;  %v2275_v10 = vmul.f32 %v2215_v9, %v3911_v58  ;;  %v2273_v41 = vmul.f32 %v2223_v46, %v3901_v12 }
 0x32d   :  { %v2244_v63 = vrot.slane %v2236_v32, %v3738_v55  ;;  %v2251_v51 = vrot.slane %v2237_v8, %v3738_v55  ;;  %v2277_v27 = vmul.f32 %v2223_v46, %v3913_v4  ;;  %v2270_v4 = vmul.f32 %v4022_v14, %v3895_v18 }
 0x32e   :  { %v2274_v31 = vmul.f32 %v4022_v14, %v3905_v17  ;;  %v2272_v11 = vmul.f32 %v4025_v3, %v3897_v35  ;;  %v2276_v53 = vmul.f32 %v4025_v3, %v3907_v44  ;;  %v2285_v56 = vmul.f32 %v2223_v46, %v3949_v34 }
 0x32f   :  { %v2252_v25 = vcombine.low %v2244_v63, %v2251_v51  ;;  %v2279_v57 = vmul.f32 %v2215_v9, %v3931_v2  ;;  %v2283_v42 = vmul.f32 %v2215_v9, %v3947_v5  ;;  %v2281_v18 = vmul.f32 %v2223_v46, %v3933_v16  ;;  %v4124_v5 = vld [vmem:[#allocation10_spill] sm:$0xff]  ;;  %v4125_v9 = vld [vmem:[#allocation9_spill] sm:$0xff] }
 0x330   :  { %v2278_v2 = vmul.f32 %v4022_v14, %v3927_v49  ;;  %v2282_v16 = vmul.f32 %v4022_v14, %v3939_v47  ;;  %v2280_v46 = vmul.f32 %v4025_v3, %v4124_v5  ;;  %v2896_v47 = vld [vmem:[%s4112_s10] ss:$0 sm:$0xff] }
 0x331   :  { %v2259_v30 = vrot.slane %v2252_v25, %v3738_v55  ;;  %v2268_v55 = vmul.f32 %v4025_v3, %v3869_v50 }
 0x333   :  { %v2261_v61 = vsub.f32 %v2206_v13, %v2259_v30 }
 0x335   :  { %v2294_v21 = vrot.slane %v2261_v61, %v3556_v39  ;;  %v2302_v60 = vrot.slane %v2261_v61, %v3559_v40  ;;  %v2290_v52 = vrot.slane %v2261_v61, %v3550_v37  ;;  %v2298_v20 = vrot.slane %v2261_v61, %v3553_v38 }
 0x337   :  { %v2308_v45 = vadd.f32 %v2294_v21, %v2263_v59  ;;  %v2312_v26 = vadd.f32 %v2294_v21, %v2267_v6  ;;  %v2310_v48 = vadd.f32 %v2302_v60, %v2265_v23  ;;  %v2314_v50 = vadd.f32 %v2302_v60, %v2269_v1 }
 0x338   :  { %v2307_v7 = vadd.f32 %v2290_v52, %v2262_v15  ;;  %v2311_v39 = vadd.f32 %v2290_v52, %v2266_v33  ;;  %v2309_v54 = vadd.f32 %v2298_v20, %v2264_v19  ;;  %v2313_v40 = vadd.f32 %v2298_v20, %v2268_v55 }
 0x339   :  { %v2332_v62 = vpack.c.bf16 %v2312_v26, %v2308_v45  ;;  %v2334_v37 = vpack.c.bf16 %v2314_v50, %v2310_v48  ;;  %v2316_v28 = vadd.f32 %v2294_v21, %v2271_v0  ;;  %v2320_v38 = vadd.f32 %v2294_v21, %v2275_v10 }
 0x33a   :  { %v2331_v29 = vpack.c.bf16 %v2311_v39, %v2307_v7  ;;  %v2333_v43 = vpack.c.bf16 %v2313_v40, %v2309_v54  ;;  %v2318_v36 = vadd.f32 %v2302_v60, %v2273_v41  ;;  %v2322_v58 = vadd.f32 %v2302_v60, %v2277_v27 }
 0x33b   :  { %2638 = vmatprep.mubr.bf16.mxu0 %v2332_v62  ;;  %2695 = vmatprep.mubr.bf16.mxu1 %v2334_v37  ;;  %v2336_v12 = vpack.c.bf16 %v2320_v38, %v2316_v28  ;;  %v2315_v17 = vadd.f32 %v2290_v52, %v2270_v4  ;;  %v2319_v24 = vadd.f32 %v2290_v52, %v2274_v31 }
 0x33c   :  { %2639 = vmatmul.mubr.bf16.vlgmr.msra.gmra.mrb[24].mxu0 %v2331_v29  ;;  %2696 = vmatmul.mubr.bf16.vlgmr.msra.gmra.mrb[24].mxu1 %v2333_v43  ;;  %v2338_v22 = vpack.c.bf16 %v2322_v58, %v2318_v36  ;;  %v2317_v32 = vadd.f32 %v2298_v20, %v2272_v11  ;;  %v2321_v8 = vadd.f32 %v2298_v20, %v2276_v53 }
 0x33d   :  { %2646 = vmatprep.mubr.bf16.mxu0 %v2336_v12  ;;  %v2324_v63 = vadd.f32 %v2294_v21, %v2279_v57  ;;  %v2328_v51 = vadd.f32 %v2294_v21, %v2283_v42  ;;  %v2326_v35 = vadd.f32 %v2302_v60, %v2281_v18  ;;  %v2330_v25 = vadd.f32 %v2302_v60, %v2285_v56 }
 0x33e   :  { %2703 = vmatprep.mubr.bf16.mxu1 %v2338_v22  ;;  %v2335_v13 = vpack.c.bf16 %v2319_v24, %v2315_v17  ;;  %v2337_v44 = vpack.c.bf16 %v2321_v8, %v2317_v32  ;;  %v2284_v59 = vmul.f32 %v4025_v3, %v4125_v9  ;;  %v2323_v61 = vadd.f32 %v2290_v52, %v2278_v2 }
 0x33f   :  { %v2340_v30 = vpack.c.bf16 %v2328_v51, %v2324_v63  ;;  %v2342_v34 = vpack.c.bf16 %v2330_v25, %v2326_v35  ;;  %v2327_v6 = vadd.f32 %v2290_v52, %v2282_v16  ;;  %v2325_v23 = vadd.f32 %v2298_v20, %v2280_v46 }
 0x340   :  { %v2329_v1 = vadd.f32 %v2298_v20, %v2284_v59 }
 0x341   :  { %v2339_v15 = vpack.c.bf16 %v2327_v6, %v2323_v61 }
 0x342   :  { %v2341_v33 = vpack.c.bf16 %v2329_v1, %v2325_v23 }
 0x344   :  { %2647 = vmatmul.mubr.bf16.gmra.mrb[28].mxu0 %v2335_v13  ;;  %2704 = vmatmul.mubr.bf16.gmra.mrb[28].mxu1 %v2337_v44 }
 0x345   :  { %2654 = vmatprep.mubr.bf16.mxu0 %v2340_v30  ;;  %2711 = vmatprep.mubr.bf16.mxu1 %v2342_v34 }
 0x34c   :  { %2655 = vmatmul.mubr.bf16.gmra.mrb[32].mxu0 %v2339_v15  ;;  %2712 = vmatmul.mubr.bf16.gmra.mrb[32].mxu1 %v2341_v33 }
 0x40f   :  { %v2945_v49 = vpop.f32.mrb[24].mxu0  ;;  %v2979_v19 = vpop.f32.mrb[24].mxu1 }
 0x410   :  { %v2946_v14 = vpop.f32.mrb[25].mxu0  ;;  %v2980_v55 = vpop.f32.mrb[25].mxu1 }
 0x411   :  { %v2947_v21 = vadd.f32 %v2946_v14, %v2945_v49  ;;  %v2981_v3 = vadd.f32 %v2980_v55, %v2979_v19  ;;  %v2948_v60 = vpop.f32.mrb[26].mxu0  ;;  %v2982_v0 = vpop.f32.mrb[26].mxu1 }
 0x412   :  { %v2949_v10 = vpop.f32.mrb[27].mxu0  ;;  %v2983_v52 = vpop.f32.mrb[27].mxu1 }
 0x413   :  { %v2641_v41 = vadd.f32 %v2947_v21, %v2896_v47  ;;  %v2950_v20 = vadd.f32 %v2949_v10, %v2948_v60  ;;  %v2984_v27 = vadd.f32 %v2983_v52, %v2982_v0 }
 0x415   :  { %v2698_v45 = vadd.f32 %v2981_v3, %v2641_v41  ;;  %v2644_v26 = vadd.f32 %v2950_v20, %v2896_v47 }
 0x417   :  { %2720 = vst [vmem:[%s4113_s11] sm:$0xff] %v2698_v45  ;;  %v2701_v48 = vadd.f32 %v2984_v27, %v2644_v26  ;;  %v2951_v50 = vpop.f32.mrb[28].mxu0  ;;  %v2985_v7 = vpop.f32.mrb[28].mxu1 }
 0x418   :  { %v2952_v39 = vpop.f32.mrb[29].mxu0  ;;  %v2986_v54 = vpop.f32.mrb[29].mxu1 }
 0x419   :  { %2721 = vst [vmem:[%s4113_s11 + $0x8] sm:$0xff] %v2701_v48  ;;  %v2953_v40 = vadd.f32 %v2952_v39, %v2951_v50  ;;  %v2987_v62 = vadd.f32 %v2986_v54, %v2985_v7  ;;  %v2954_v37 = vpop.f32.mrb[30].mxu0  ;;  %v2988_v28 = vpop.f32.mrb[30].mxu1 }
 0x41a   :  { %v2955_v38 = vpop.f32.mrb[31].mxu0  ;;  %v2989_v29 = vpop.f32.mrb[31].mxu1 }
 0x41b   :  { %v2649_v43 = vadd.f32 %v2953_v40, %v2896_v47  ;;  %v2956_v36 = vadd.f32 %v2955_v38, %v2954_v37  ;;  %v2990_v58 = vadd.f32 %v2989_v29, %v2988_v28 }
 0x41d   :  { %v2706_v12 = vadd.f32 %v2987_v62, %v2649_v43  ;;  %v2652_v4 = vadd.f32 %v2956_v36, %v2896_v47 }
 0x41f   :  { %2722 = vst [vmem:[%s4113_s11 + $0x10] sm:$0xff] %v2706_v12  ;;  %v2709_v31 = vadd.f32 %v2990_v58, %v2652_v4  ;;  %v2957_v22 = vpop.f32.mrb[32].mxu0  ;;  %v2991_v11 = vpop.f32.mrb[32].mxu1 }
 0x420   :  { %v2958_v53 = vpop.f32.mrb[33].mxu0  ;;  %v2992_v56 = vpop.f32.mrb[33].mxu1 }
 0x421   :  { %2723 = vst [vmem:[%s4113_s11 + $0x18] sm:$0xff] %v2709_v31  ;;  %v2959_v57 = vadd.f32 %v2958_v53, %v2957_v22  ;;  %v2993_v42 = vadd.f32 %v2992_v56, %v2991_v11  ;;  %v2960_v18 = vpop.f32.mrb[34].mxu0  ;;  %v2994_v17 = vpop.f32.mrb[34].mxu1 }
 0x422   :  { %v2961_v24 = vpop.f32.mrb[35].mxu0  ;;  %v2995_v32 = vpop.f32.mrb[35].mxu1 }
 0x423   :  { %v2657_v8 = vadd.f32 %v2959_v57, %v2896_v47  ;;  %v2962_v63 = vadd.f32 %v2961_v24, %v2960_v18  ;;  %v2996_v51 = vadd.f32 %v2995_v32, %v2994_v17 }
 0x425   :  { %v2714_v35 = vadd.f32 %v2993_v42, %v2657_v8  ;;  %v2660_v25 = vadd.f32 %v2962_v63, %v2896_v47 }
 0x427   :  { %2724 = vst [vmem:[%s4113_s11 + $0x20] sm:$0xff] %v2714_v35  ;;  %v2717_v13 = vadd.f32 %v2996_v51, %v2660_v25 }
 0x429   :  { %2725 = vst [vmem:[%s4113_s11 + $0x28] sm:$0xff] %v2717_v13 }
 0x42a   :  { %2730 = vsyncpa [#allocation3], 1 }
 0x42b   :  { %2731 = vsyncpa [#allocation5], 1 }

</bundles_post_ra>
